<compile_context>
chip_gen: v7x
topology: tpu7x:2x2x1
jax: 0.10.0
libtpu: 0.0.40
codegen_flags: <defaults>
</compile_context>

<pallas_src>
import jax
import jax.numpy as jnp
from jax.experimental import pallas as pl
from jax.experimental.pallas import tpu as pltpu

NEG_SLOPE = 0.01   # nn.LeakyReLU default negative_slope
EPS = 1e-5         # nn.InstanceNorm2d default eps


def _leaky(x):
    return jnp.where(x >= 0, x, NEG_SLOPE * x)


# --------------------------------------------------------------------------
# Init-time weight preprocessing (pure layout plumbing, built once).
# --------------------------------------------------------------------------
def conv_band_matrix(w_t, width):
    """3x3 conv weights (3, 3, Cin, Cout) -> K-stacked banded matrix (3*width*Cin, width*Cout).

    Row block dy holds M_dy with
      M_dy[w_in*Cin + ci, w_out*Cout + co] = w_t[dy, w_in - w_out + 1, ci, co]
    for |w_in - w_out| <= 1 (zeros elsewhere encode horizontal 'same' padding).
    """
    _, _, cin, cout = w_t.shape
    wi = jnp.arange(width)[:, None]
    wo = jnp.arange(width)[None, :]
    d = wi - wo + 1                                    # dx tap index
    valid = ((d >= 0) & (d <= 2)).astype(w_t.dtype)
    idx = jnp.clip(d, 0, 2)
    mats = []
    for dy in range(3):
        taps = w_t[dy]                                 # (3, Cin, Cout), indexed by dx
        m = taps[idx] * valid[:, :, None, None]        # (width, width, Cin, Cout)
        m = jnp.transpose(m, (0, 2, 1, 3)).reshape(width * cin, width * cout)
        mats.append(m)
    return jnp.concatenate(mats, axis=0)               # (3*width*Cin, width*Cout)


def upconv_band_matrix(w_t, width):
    """ConvTranspose2d(k=2,s=2) weights (Cin, Cout, 2, 2) -> (width*Cin, 2*width*Cout*... ).

    Output lanes [0:L] = even output rows (dh=0), [L:2L] = odd output rows (dh=1);
    each parity matrix is block-diagonal over the input width.
    """
    eye = jnp.eye(width, dtype=w_t.dtype)
    mats = []
    for dh in range(2):
        blk = jnp.concatenate([w_t[:, :, dh, 0], w_t[:, :, dh, 1]], axis=1)   # (Cin, 2*Cout)
        mats.append(jnp.kron(eye, blk))                # (width*Cin, 2*width*Cout) = (.., L)
    return jnp.concatenate(mats, axis=1)               # (width*Cin, 2L)


def interleave_matrix(nb, H):
    """Row permutation P (nb*2H, 2*nb*H): interleaved_rows = P @ [even_rows ; odd_rows]."""
    Hc = 2 * H
    rows = jnp.arange(nb * Hc)
    n = rows // Hc
    w = rows % Hc
    src = (w % 2) * (nb * H) + n * H + (w // 2)
    return (src[:, None] == jnp.arange(2 * nb * H)[None, :]).astype(jnp.float32)


def channel_proj(Wc, cm, inv_cnt):
    """Per-channel selector (L, L), pre-scaled by 1/(H*W); lane l has channel l % cm."""
    L = Wc * cm
    lane = jnp.arange(L)
    return (lane[:, None] % cm == lane[None, :] % cm).astype(jnp.float32) * inv_cnt


def _pick_nb(N, Hc):
    """Batch samples stacked per grid step: fill M toward 128..256 MXU rows, but keep
    >= 2 grid steps (DMA overlap / megacore) when that still leaves M well filled."""
    divs = [c for c in range(1, N + 1) if N % c == 0 and c * Hc <= 256]
    if not divs:
        return 1
    best = max(divs)
    good = [c for c in divs if N // c >= 2 and c * Hc >= 128]
    if good:
        best = max(good)
    return best


# --------------------------------------------------------------------------
# Fused UpBlock kernel (one grid step = Nb samples).
# --------------------------------------------------------------------------
def _make_upblock_kernel(Nb, H, Wcin, cm, Wc, num_conv):
    Hc = 2 * H
    L = Wc * cm
    M = Nb * Hc

    def norm_act(acc, proj):
        # Per-sample per-channel InstanceNorm on a (M, L) f32 accumulation.
        a3 = acc.reshape(Nb, Hc, L)
        rsum = a3.sum(axis=1)                                   # (Nb, L)
        rsq = (a3 * a3).sum(axis=1)                             # (Nb, L)
        st = jnp.concatenate([rsum, rsq], axis=0)               # (2Nb, L), one fused stats dot
        red = jnp.dot(st, proj, preferred_element_type=jnp.float32)   # proj pre-scaled by 1/(H*W)
        mean, ex2 = red[:Nb], red[Nb:]
        inv = jax.lax.rsqrt(jnp.maximum(ex2 - mean * mean, 0.0) + EPS)
        y = (a3 - mean[:, None, :]) * inv[:, None, :]
        return _leaky(y).reshape(M, L).astype(jnp.bfloat16)

    def taps(t):
        # Vertical conv taps of a (M, L) tensor: rows shifted by +/-1 with zero rows at
        # every per-sample top/bottom boundary ('same' padding, no sample bleed).
        z = jnp.zeros((1, L), t.dtype)
        dn = jnp.concatenate([z, t[:M - 1, :]], axis=0)         # row h -> t[h-1]
        up = jnp.concatenate([t[1:, :], z], axis=0)             # row h -> t[h+1]
        if Nb > 1:
            row = jax.lax.broadcasted_iota(jnp.int32, (M, 1), 0)
            dn = jnp.where(row % Hc == 0, jnp.zeros_like(dn), dn)
            up = jnp.where(row % Hc == Hc - 1, jnp.zeros_like(up), up)
        return dn, up

    def kernel(x_ref, skip_ref, mup_ref, pint_ref, m1_ref, *rest):
        mj_refs = rest[:num_conv - 1]
        proj_ref = rest[num_conv - 1]
        o_ref = rest[num_conv]
        proj = proj_ref[...]                                    # (L, L) f32

        # ---- ConvUpPool: ConvTranspose2d(k=2,s=2) as one bf16 matmul producing both
        #      output-row parities lane-concatenated, then an exact row-permutation
        #      matmul (depth-to-space), then InstanceNorm + LeakyReLU.
        x = x_ref[...].astype(jnp.bfloat16)                     # (Nb*H, W*cin)
        up2 = jnp.dot(x, mup_ref[...], preferred_element_type=jnp.float32)     # (Nb*H, 2L)
        stacked = jnp.concatenate([up2[:, :L], up2[:, L:]], axis=0)            # (2*Nb*H, L)
        up_rows = jnp.dot(pint_ref[...], stacked, preferred_element_type=jnp.float32)  # (M, L)
        up = norm_act(up_rows, proj)                            # bf16 (M, L)

        # ---- conv 1 on cat([skip, up], channel): linearity -> two weight halves,
        #      K-stacked into one (M, 6L) @ (6L, L) MXU matmul.
        skip = skip_ref[...].astype(jnp.bfloat16)               # (M, L)
        dn_s, up_s = taps(skip)
        dn_u, up_u = taps(up)
        lhs = jnp.concatenate([dn_s, skip, up_s, dn_u, up, up_u], axis=1)      # (M, 6L)
        acc = jnp.dot(lhs, m1_ref[...], preferred_element_type=jnp.float32)
        h = norm_act(acc, proj)

        # ---- remaining convs of the ConvBlock (Dropout(p=0) is identity), each one
        #      (M, 3L) @ (3L, L) matmul.
        for j in range(num_conv - 1):
            dn, upp = taps(h)
            lhs = jnp.concatenate([dn, h, upp], axis=1)                         # (M, 3L)
            acc = jnp.dot(lhs, mj_refs[j][...], preferred_element_type=jnp.float32)
            h = norm_act(acc, proj)

        o_ref[...] = h                                          # (M, L) bf16, lane-dense

    return kernel


def upblock_apply(x_flat, skip_flat, st):
    """x_flat: (N, H, W*Cin) bf16 HWC-flat; skip_flat: (N, 2H, 2W*Cm); returns (N, 2H, 2W*Cm)."""
    N, H, wcin = x_flat.shape
    assert H == st['h'] and wcin == st['wcin'], (x_flat.shape, st['h'], st['wcin'])
    cm = st['cm']
    Hc, Wc = 2 * st['h'], 2 * st['w']
    L = Wc * cm
    assert skip_flat.shape == (N, Hc, L), (skip_flat.shape, (N, Hc, L))
    Nb = st['nb']
    assert N % Nb == 0, (N, Nb)
    num_conv = st['num_conv']

    # 2-D (row = sample-major) views so every kernel ref / store stays rank-2 lane-dense.
    x2 = x_flat.reshape(N * H, wcin)
    skip2 = skip_flat.reshape(N * Hc, L)

    kernel = _make_upblock_kernel(Nb, H, wcin, cm, Wc, num_conv)

    in_specs = [
        pl.BlockSpec((Nb * H, wcin), lambda n: (n, 0)),
        pl.BlockSpec((Nb * Hc, L), lambda n: (n, 0)),
        pl.BlockSpec(st['mup'].shape, lambda n: (0, 0)),
        pl.BlockSpec(st['pint'].shape, lambda n: (0, 0)),
        pl.BlockSpec(st['m1'].shape, lambda n: (0, 0)),
    ] + [pl.BlockSpec(m.shape, lambda n: (0, 0)) for m in st['mjs']] + [
        pl.BlockSpec(st['proj'].shape, lambda n: (0, 0)),
    ]
    # TODO(synk): if channel counts / resolution grow, add pipeline_mode=pl.Buffered(1) on
    # the constant-weight specs so they are not double-buffered in VMEM (moot at L=128).

    out2 = pl.pallas_call(
        kernel,
        out_shape=jax.ShapeDtypeStruct((N * Hc, L), jnp.bfloat16),
        grid=(N // Nb,),
        in_specs=in_specs,
        out_specs=pl.BlockSpec((Nb * Hc, L), lambda n: (n, 0)),
        compiler_params=pltpu.CompilerParams(dimension_semantics=("parallel",)),
    )(x2, skip2, st['mup'], st['pint'], st['m1'], *st['mjs'], st['proj'])
    return out2.reshape(N, Hc, L)


# --------------------------------------------------------------------------
# Deterministic parameter construction + one-time kernel-constant precompute.
# --------------------------------------------------------------------------
def init_decoder_params(key, features, num_conv_per_stage, base_hw, batch):
    H, W = base_hw                       # spatial size of the deepest encoder feature map
    stages = []
    for i in range(len(features) - 1):
        cin, cm = features[i], features[i + 1]
        Hc, Wc = 2 * H, 2 * W
        key, k1 = jax.random.split(key)
        # ConvTranspose2d(cin, cm, kernel=2, stride=2): weight (cin, cm, 2, 2)
        up_w = jax.random.normal(k1, (cin, cm, 2, 2), jnp.float32) / jnp.sqrt(4.0 * cin)
        num_conv = num_conv_per_stage[i + 1]
        conv_ws = []
        for j in range(num_conv):
            key, k2 = jax.random.split(key)
            cj_in = 2 * cm if j == 0 else cm           # conv-1 input = cat([skip, up], ch)
            wc = jax.random.normal(k2, (cm, cj_in, 3, 3), jnp.float32) / jnp.sqrt(9.0 * cj_in)
            conv_ws.append(jnp.transpose(wc, (2, 3, 1, 0)))     # -> (dy, dx, Cin, Cout)
        # need_bias=True biases are exactly cancelled by the following InstanceNorm
        # (affine=False) mean subtraction -> folded away (bit-identical forward).

        nb = _pick_nb(batch, Hc)
        mup = upconv_band_matrix(up_w, W).astype(jnp.bfloat16)                  # (W*cin, 2L)
        # torch.cat([skip_features, up_features], 1): skip channel half FIRST, then up.
        m1 = jnp.concatenate(
            [conv_band_matrix(conv_ws[0][:, :, :cm, :], Wc),
             conv_band_matrix(conv_ws[0][:, :, cm:, :], Wc)],
            axis=0).astype(jnp.bfloat16)                                        # (6L, L)
        mjs = [conv_band_matrix(w, Wc).astype(jnp.bfloat16) for w in conv_ws[1:]]  # (3L, L)
        pint = interleave_matrix(nb, H)                                         # f32 perm
        proj = channel_proj(Wc, cm, 1.0 / float(Hc * Wc))                       # f32 selector
        stages.append(dict(cin=cin, cm=cm, h=H, w=W, wcin=W * cin, nb=nb,
                           num_conv=num_conv, mup=mup, m1=m1, mjs=mjs,
                           pint=pint, proj=proj))
        H, W = Hc, Wc
    return stages


# --------------------------------------------------------------------------
# Decoder.forward
# --------------------------------------------------------------------------
def decoder_forward(encoder_out_nchw, stages, output_features=False):
    def to_flat(t):                                   # NCHW -> (N, H, W*C) HWC-flat bf16
        N, C, H, W = t.shape
        return jnp.transpose(t, (0, 2, 3, 1)).reshape(N, H, W * C).astype(jnp.bfloat16)

    def from_flat(t, C):                              # (N, H, W*C) -> NCHW f32
        N, H, WC = t.shape
        return jnp.transpose(t.reshape(N, H, WC // C, C), (0, 3, 1, 2)).astype(jnp.float32)

    enc = [to_flat(t) for t in encoder_out_nchw][::-1]   # encoder_out[::-1]
    outs = []
    x = None
    for i, st in enumerate(stages):
        inp = enc[i] if i == 0 else x
        x = upblock_apply(inp, enc[i + 1], st)           # fused UpBlock (one pallas_call)
        outs.append(x)
    # TODO(synk): Dropout(dropout_p) is identity for p=0 / eval mode -> omitted.
    if output_features:
        return [from_flat(o, stages[i]['cm']) for i, o in enumerate(outs)]
    return from_flat(x, stages[-1]['cm'])


if __name__ == "__main__":
    key = jax.random.PRNGKey(0)

    # Decoder params (mirrors the PyTorch `params` dict):
    #   features = [16, 8, 4] (deepest -> shallowest), kernel_size = [[3,3]]*3,
    #   pool_kernel_size = [[2,2]]*2, dropout_p = [0.0]*3, num_conv_per_stage = [2,2,2],
    #   normalization='instancenorm', activate='leakyrelu', need_bias=True
    features = [16, 8, 4]
    num_conv_per_stage = [2, 2, 2]
    N = 2

    kp, kx0, kx1, kx2 = jax.random.split(key, 4)
    stages = init_decoder_params(kp, features, num_conv_per_stage, base_hw=(8, 8), batch=N)

    # Encoder outputs, shallowest first (NCHW, as a UNet encoder produces them).
    enc0 = jax.random.normal(kx0, (N, 4, 32, 32), jnp.float32)
    enc1 = jax.random.normal(kx1, (N, 8, 16, 16), jnp.float32)
    enc2 = jax.random.normal(kx2, (N, 16, 8, 8), jnp.float32)

    out = decoder_forward([enc0, enc1, enc2], stages, output_features=False)
    out = jax.block_until_ready(out)
    assert out.shape == (N, 4, 32, 32), out.shape
    assert bool(jnp.all(jnp.isfinite(out)))
    print("KERNEL_OK")
</pallas_src>

<mosaic_0001>
module attributes {stable_mosaic.version = 11 : i64} {
  func.func @kernel(%arg0: i32, %arg1: memref<16x128xbf16, #tpu.memory_space<vmem>>, %arg2: memref<32x128xbf16, #tpu.memory_space<vmem>>, %arg3: memref<128x256xbf16, #tpu.memory_space<vmem>>, %arg4: memref<32x32xf32, #tpu.memory_space<vmem>>, %arg5: memref<768x128xbf16, #tpu.memory_space<vmem>>, %arg6: memref<384x128xbf16, #tpu.memory_space<vmem>>, %arg7: memref<128x128xf32, #tpu.memory_space<vmem>>, %arg8: memref<32x128xbf16, #tpu.memory_space<vmem>>) attributes {dimension_semantics = [#tpu.dimension_semantics<parallel>], iteration_bounds = array<i64: 1>, scalar_prefetch = 0 : i64, scratch_operands = 0 : i64, tpu.core_type = #tpu.core_type<tc>, window_params = [{transform_indices = @transform_0, window_bounds = array<i64: 16, 128>}, {transform_indices = @transform_1, window_bounds = array<i64: 32, 128>}, {pipeline_mode = #tpu.pipeline_mode<synchronous>, transform_indices = @transform_2, window_bounds = array<i64: 128, 256>}, {pipeline_mode = #tpu.pipeline_mode<synchronous>, transform_indices = @transform_3, window_bounds = array<i64: 32, 32>}, {pipeline_mode = #tpu.pipeline_mode<synchronous>, transform_indices = @transform_4, window_bounds = array<i64: 768, 128>}, {pipeline_mode = #tpu.pipeline_mode<synchronous>, transform_indices = @transform_5, window_bounds = array<i64: 384, 128>}, {pipeline_mode = #tpu.pipeline_mode<synchronous>, transform_indices = @transform_6, window_bounds = array<i64: 128, 128>}, {transform_indices = @transform_7, window_bounds = array<i64: 32, 128>}]} {
    %c0 = arith.constant 0 : index
    %c0_0 = arith.constant 0 : index
    %0 = vector.load %arg7[%c0, %c0_0] : memref<128x128xf32, #tpu.memory_space<vmem>>, vector<128x128xf32>
    %c0_1 = arith.constant 0 : index
    %c0_2 = arith.constant 0 : index
    %1 = vector.load %arg1[%c0_1, %c0_2] : memref<16x128xbf16, #tpu.memory_space<vmem>>, vector<16x128xbf16>
    %c0_3 = arith.constant 0 : index
    %c0_4 = arith.constant 0 : index
    %2 = vector.load %arg3[%c0_3, %c0_4] : memref<128x256xbf16, #tpu.memory_space<vmem>>, vector<128x256xbf16>
    %cst = arith.constant dense<0.000000e+00> : vector<16x256xf32>
    %3 = tpu.matmul %1, %2, %cst {dimension_numbers = #tpu.dot_dimension_numbers<[1], [0], [0], [1], [0, 0, 1, 1], [], []>} : vector<16x128xbf16>, vector<128x256xbf16>, vector<16x256xf32> -> vector<16x256xf32>
    %4 = vector.extract_strided_slice %3 {offsets = [0, 0], sizes = [16, 128], strides = [1, 1]} : vector<16x256xf32> to vector<16x128xf32>
    %5 = vector.extract_strided_slice %3 {offsets = [0, 128], sizes = [16, 128], strides = [1, 1]} : vector<16x256xf32> to vector<16x128xf32>
    %6 = tpu.concatenate %4, %5 in 0 : vector<16x128xf32>, vector<16x128xf32> -> vector<32x128xf32>
    %c0_5 = arith.constant 0 : index
    %c0_6 = arith.constant 0 : index
    %7 = vector.load %arg4[%c0_5, %c0_6] : memref<32x32xf32, #tpu.memory_space<vmem>>, vector<32x32xf32>
    %cst_7 = arith.constant dense<0.000000e+00> : vector<32x128xf32>
    %8 = tpu.matmul %7, %6, %cst_7 {dimension_numbers = #tpu.dot_dimension_numbers<[1], [0], [0], [1], [0, 0, 1, 1], [], []>} : vector<32x32xf32>, vector<32x128xf32>, vector<32x128xf32> -> vector<32x128xf32>
    %9 = vector.shape_cast %8 : vector<32x128xf32> to vector<2x16x128xf32>
    %cst_8 = arith.constant dense<0.000000e+00> : vector<2x128xf32>
    %10 = vector.multi_reduction <add>, %9, %cst_8 [1] : vector<2x16x128xf32> to vector<2x128xf32>
    %11 = arith.mulf %9, %9 : vector<2x16x128xf32>
    %cst_9 = arith.constant dense<0.000000e+00> : vector<2x128xf32>
    %12 = vector.multi_reduction <add>, %11, %cst_9 [1] : vector<2x16x128xf32> to vector<2x128xf32>
    %13 = tpu.concatenate %10, %12 in 0 : vector<2x128xf32>, vector<2x128xf32> -> vector<4x128xf32>
    %cst_10 = arith.constant dense<0.000000e+00> : vector<4x128xf32>
    %14 = tpu.matmul %13, %0, %cst_10 {dimension_numbers = #tpu.dot_dimension_numbers<[1], [0], [0], [1], [0, 0, 1, 1], [], []>} : vector<4x128xf32>, vector<128x128xf32>, vector<4x128xf32> -> vector<4x128xf32>
    %15 = vector.extract_strided_slice %14 {offsets = [0, 0], sizes = [2, 128], strides = [1, 1]} : vector<4x128xf32> to vector<2x128xf32>
    %16 = vector.extract_strided_slice %14 {offsets = [2, 0], sizes = [2, 128], strides = [1, 1]} : vector<4x128xf32> to vector<2x128xf32>
    %17 = arith.mulf %15, %15 : vector<2x128xf32>
    %18 = arith.subf %16, %17 : vector<2x128xf32>
    %cst_11 = arith.constant 0.000000e+00 : f32
    %19 = vector.broadcast %cst_11 : f32 to vector<2x128xf32>
    %20 = arith.maximumf %18, %19 : vector<2x128xf32>
    %cst_12 = arith.constant 9.99999974E-6 : f32
    %21 = vector.broadcast %cst_12 : f32 to vector<2x128xf32>
    %22 = arith.addf %20, %21 : vector<2x128xf32>
    %23 = math.rsqrt %22 : vector<2x128xf32>
    %24 = vector.shape_cast %15 : vector<2x128xf32> to vector<2x1x128xf32>
    %25 = vector.broadcast %24 : vector<2x1x128xf32> to vector<2x16x128xf32>
    %26 = arith.subf %9, %25 : vector<2x16x128xf32>
    %27 = vector.shape_cast %23 : vector<2x128xf32> to vector<2x1x128xf32>
    %28 = vector.broadcast %27 : vector<2x1x128xf32> to vector<2x16x128xf32>
    %29 = arith.mulf %26, %28 : vector<2x16x128xf32>
    %cst_13 = arith.constant 0.000000e+00 : f32
    %30 = vector.broadcast %cst_13 : f32 to vector<2x16x128xf32>
    %31 = arith.cmpf oge, %29, %30 : vector<2x16x128xf32>
    %cst_14 = arith.constant 0.00999999977 : f32
    %32 = vector.broadcast %cst_14 : f32 to vector<2x16x128xf32>
    %33 = arith.mulf %32, %29 : vector<2x16x128xf32>
    %34 = arith.select %31, %29, %33 : vector<2x16x128xi1>, vector<2x16x128xf32>
    %35 = vector.shape_cast %34 : vector<2x16x128xf32> to vector<32x128xf32>
    %36 = arith.truncf %35 : vector<32x128xf32> to vector<32x128xbf16>
    %c0_15 = arith.constant 0 : index
    %c0_16 = arith.constant 0 : index
    %37 = vector.load %arg2[%c0_15, %c0_16] : memref<32x128xbf16, #tpu.memory_space<vmem>>, vector<32x128xbf16>
    %cst_17 = arith.constant 0.000000e+00 : bf16
    %38 = vector.broadcast %cst_17 : bf16 to vector<1x128xbf16>
    %39 = vector.extract_strided_slice %37 {offsets = [0, 0], sizes = [31, 128], strides = [1, 1]} : vector<32x128xbf16> to vector<31x128xbf16>
    %40 = tpu.concatenate %38, %39 in 0 : vector<1x128xbf16>, vector<31x128xbf16> -> vector<32x128xbf16>
    %41 = vector.extract_strided_slice %37 {offsets = [1, 0], sizes = [31, 128], strides = [1, 1]} : vector<32x128xbf16> to vector<31x128xbf16>
    %42 = tpu.concatenate %41, %38 in 0 : vector<31x128xbf16>, vector<1x128xbf16> -> vector<32x128xbf16>
    %43 = tpu.iota {dimensions = array<i32: 0>} : vector<32x1xi32>
    %c16_i32 = arith.constant 16 : i32
    %c0_i32 = arith.constant 0 : i32
    %44 = arith.cmpi eq, %c16_i32, %c0_i32 : i32
    %c1_i32 = arith.constant 1 : i32
    %45 = arith.select %44, %c1_i32, %c16_i32 : i32
    %46 = vector.broadcast %45 : i32 to vector<32x1xi32>
    %47 = arith.remsi %43, %46 : vector<32x1xi32>
    %c0_i32_18 = arith.constant 0 : i32
    %48 = vector.broadcast %c0_i32_18 : i32 to vector<32x1xi32>
    %49 = arith.cmpi ne, %47, %48 : vector<32x1xi32>
    %c0_i32_19 = arith.constant 0 : i32
    %50 = vector.broadcast %c0_i32_19 : i32 to vector<32x1xi32>
    %51 = arith.cmpi slt, %47, %50 : vector<32x1xi32>
    %c0_i32_20 = arith.constant 0 : i32
    %52 = arith.cmpi slt, %45, %c0_i32_20 : i32
    %53 = vector.broadcast %52 : i1 to vector<32x1xi1>
    %54 = vector.broadcast %53 : vector<32x1xi1> to vector<32x1xi1>
    %55 = arith.xori %51, %54 : vector<32x1xi1>
    %56 = arith.andi %55, %49 : vector<32x1xi1>
    %57 = vector.broadcast %45 : i32 to vector<32x1xi32>
    %58 = arith.addi %47, %57 : vector<32x1xi32>
    %59 = arith.select %56, %58, %47 : vector<32x1xi1>, vector<32x1xi32>
    %c0_i32_21 = arith.constant 0 : i32
    %60 = vector.broadcast %c0_i32_21 : i32 to vector<32x1xi32>
    %61 = arith.cmpi eq, %59, %60 : vector<32x1xi32>
    %cst_22 = arith.constant 0.000000e+00 : bf16
    %62 = vector.broadcast %cst_22 : bf16 to vector<32x128xbf16>
    %63 = vector.shape_cast %61 : vector<32x1xi1> to vector<32x1xi1>
    %64 = vector.broadcast %63 : vector<32x1xi1> to vector<32x128xi1>
    %65 = arith.select %64, %62, %40 : vector<32x128xi1>, vector<32x128xbf16>
    %c16_i32_23 = arith.constant 16 : i32
    %c0_i32_24 = arith.constant 0 : i32
    %66 = arith.cmpi eq, %c16_i32_23, %c0_i32_24 : i32
    %c1_i32_25 = arith.constant 1 : i32
    %67 = arith.select %66, %c1_i32_25, %c16_i32_23 : i32
    %68 = vector.broadcast %67 : i32 to vector<32x1xi32>
    %69 = arith.remsi %43, %68 : vector<32x1xi32>
    %c0_i32_26 = arith.constant 0 : i32
    %70 = vector.broadcast %c0_i32_26 : i32 to vector<32x1xi32>
    %71 = arith.cmpi ne, %69, %70 : vector<32x1xi32>
    %c0_i32_27 = arith.constant 0 : i32
    %72 = vector.broadcast %c0_i32_27 : i32 to vector<32x1xi32>
    %73 = arith.cmpi slt, %69, %72 : vector<32x1xi32>
    %c0_i32_28 = arith.constant 0 : i32
    %74 = arith.cmpi slt, %67, %c0_i32_28 : i32
    %75 = vector.broadcast %74 : i1 to vector<32x1xi1>
    %76 = vector.broadcast %75 : vector<32x1xi1> to vector<32x1xi1>
    %77 = arith.xori %73, %76 : vector<32x1xi1>
    %78 = arith.andi %77, %71 : vector<32x1xi1>
    %79 = vector.broadcast %67 : i32 to vector<32x1xi32>
    %80 = arith.addi %69, %79 : vector<32x1xi32>
    %81 = arith.select %78, %80, %69 : vector<32x1xi1>, vector<32x1xi32>
    %c15_i32 = arith.constant 15 : i32
    %82 = vector.broadcast %c15_i32 : i32 to vector<32x1xi32>
    %83 = arith.cmpi eq, %81, %82 : vector<32x1xi32>
    %cst_29 = arith.constant 0.000000e+00 : bf16
    %84 = vector.broadcast %cst_29 : bf16 to vector<32x128xbf16>
    %85 = vector.shape_cast %83 : vector<32x1xi1> to vector<32x1xi1>
    %86 = vector.broadcast %85 : vector<32x1xi1> to vector<32x128xi1>
    %87 = arith.select %86, %84, %42 : vector<32x128xi1>, vector<32x128xbf16>
    %cst_30 = arith.constant 0.000000e+00 : bf16
    %88 = vector.broadcast %cst_30 : bf16 to vector<1x128xbf16>
    %89 = vector.extract_strided_slice %36 {offsets = [0, 0], sizes = [31, 128], strides = [1, 1]} : vector<32x128xbf16> to vector<31x128xbf16>
    %90 = tpu.concatenate %88, %89 in 0 : vector<1x128xbf16>, vector<31x128xbf16> -> vector<32x128xbf16>
    %91 = vector.extract_strided_slice %36 {offsets = [1, 0], sizes = [31, 128], strides = [1, 1]} : vector<32x128xbf16> to vector<31x128xbf16>
    %92 = tpu.concatenate %91, %88 in 0 : vector<31x128xbf16>, vector<1x128xbf16> -> vector<32x128xbf16>
    %93 = tpu.iota {dimensions = array<i32: 0>} : vector<32x1xi32>
    %c16_i32_31 = arith.constant 16 : i32
    %c0_i32_32 = arith.constant 0 : i32
    %94 = arith.cmpi eq, %c16_i32_31, %c0_i32_32 : i32
    %c1_i32_33 = arith.constant 1 : i32
    %95 = arith.select %94, %c1_i32_33, %c16_i32_31 : i32
    %96 = vector.broadcast %95 : i32 to vector<32x1xi32>
    %97 = arith.remsi %93, %96 : vector<32x1xi32>
    %c0_i32_34 = arith.constant 0 : i32
    %98 = vector.broadcast %c0_i32_34 : i32 to vector<32x1xi32>
    %99 = arith.cmpi ne, %97, %98 : vector<32x1xi32>
    %c0_i32_35 = arith.constant 0 : i32
    %100 = vector.broadcast %c0_i32_35 : i32 to vector<32x1xi32>
    %101 = arith.cmpi slt, %97, %100 : vector<32x1xi32>
    %c0_i32_36 = arith.constant 0 : i32
    %102 = arith.cmpi slt, %95, %c0_i32_36 : i32
    %103 = vector.broadcast %102 : i1 to vector<32x1xi1>
    %104 = vector.broadcast %103 : vector<32x1xi1> to vector<32x1xi1>
    %105 = arith.xori %101, %104 : vector<32x1xi1>
    %106 = arith.andi %105, %99 : vector<32x1xi1>
    %107 = vector.broadcast %95 : i32 to vector<32x1xi32>
    %108 = arith.addi %97, %107 : vector<32x1xi32>
    %109 = arith.select %106, %108, %97 : vector<32x1xi1>, vector<32x1xi32>
    %c0_i32_37 = arith.constant 0 : i32
    %110 = vector.broadcast %c0_i32_37 : i32 to vector<32x1xi32>
    %111 = arith.cmpi eq, %109, %110 : vector<32x1xi32>
    %cst_38 = arith.constant 0.000000e+00 : bf16
    %112 = vector.broadcast %cst_38 : bf16 to vector<32x128xbf16>
    %113 = vector.shape_cast %111 : vector<32x1xi1> to vector<32x1xi1>
    %114 = vector.broadcast %113 : vector<32x1xi1> to vector<32x128xi1>
    %115 = arith.select %114, %112, %90 : vector<32x128xi1>, vector<32x128xbf16>
    %c16_i32_39 = arith.constant 16 : i32
    %c0_i32_40 = arith.constant 0 : i32
    %116 = arith.cmpi eq, %c16_i32_39, %c0_i32_40 : i32
    %c1_i32_41 = arith.constant 1 : i32
    %117 = arith.select %116, %c1_i32_41, %c16_i32_39 : i32
    %118 = vector.broadcast %117 : i32 to vector<32x1xi32>
    %119 = arith.remsi %93, %118 : vector<32x1xi32>
    %c0_i32_42 = arith.constant 0 : i32
    %120 = vector.broadcast %c0_i32_42 : i32 to vector<32x1xi32>
    %121 = arith.cmpi ne, %119, %120 : vector<32x1xi32>
    %c0_i32_43 = arith.constant 0 : i32
    %122 = vector.broadcast %c0_i32_43 : i32 to vector<32x1xi32>
    %123 = arith.cmpi slt, %119, %122 : vector<32x1xi32>
    %c0_i32_44 = arith.constant 0 : i32
    %124 = arith.cmpi slt, %117, %c0_i32_44 : i32
    %125 = vector.broadcast %124 : i1 to vector<32x1xi1>
    %126 = vector.broadcast %125 : vector<32x1xi1> to vector<32x1xi1>
    %127 = arith.xori %123, %126 : vector<32x1xi1>
    %128 = arith.andi %127, %121 : vector<32x1xi1>
    %129 = vector.broadcast %117 : i32 to vector<32x1xi32>
    %130 = arith.addi %119, %129 : vector<32x1xi32>
    %131 = arith.select %128, %130, %119 : vector<32x1xi1>, vector<32x1xi32>
    %c15_i32_45 = arith.constant 15 : i32
    %132 = vector.broadcast %c15_i32_45 : i32 to vector<32x1xi32>
    %133 = arith.cmpi eq, %131, %132 : vector<32x1xi32>
    %cst_46 = arith.constant 0.000000e+00 : bf16
    %134 = vector.broadcast %cst_46 : bf16 to vector<32x128xbf16>
    %135 = vector.shape_cast %133 : vector<32x1xi1> to vector<32x1xi1>
    %136 = vector.broadcast %135 : vector<32x1xi1> to vector<32x128xi1>
    %137 = arith.select %136, %134, %92 : vector<32x128xi1>, vector<32x128xbf16>
    %138 = tpu.concatenate %65, %37, %87, %115, %36, %137 in 1 : vector<32x128xbf16>, vector<32x128xbf16>, vector<32x128xbf16>, vector<32x128xbf16>, vector<32x128xbf16>, vector<32x128xbf16> -> vector<32x768xbf16>
    %c0_47 = arith.constant 0 : index
    %c0_48 = arith.constant 0 : index
    %139 = vector.load %arg5[%c0_47, %c0_48] : memref<768x128xbf16, #tpu.memory_space<vmem>>, vector<768x128xbf16>
    %cst_49 = arith.constant dense<0.000000e+00> : vector<32x128xf32>
    %140 = tpu.matmul %138, %139, %cst_49 {dimension_numbers = #tpu.dot_dimension_numbers<[1], [0], [0], [1], [0, 0, 1, 1], [], []>} : vector<32x768xbf16>, vector<768x128xbf16>, vector<32x128xf32> -> vector<32x128xf32>
    %141 = vector.shape_cast %140 : vector<32x128xf32> to vector<2x16x128xf32>
    %cst_50 = arith.constant dense<0.000000e+00> : vector<2x128xf32>
    %142 = vector.multi_reduction <add>, %141, %cst_50 [1] : vector<2x16x128xf32> to vector<2x128xf32>
    %143 = arith.mulf %141, %141 : vector<2x16x128xf32>
    %cst_51 = arith.constant dense<0.000000e+00> : vector<2x128xf32>
    %144 = vector.multi_reduction <add>, %143, %cst_51 [1] : vector<2x16x128xf32> to vector<2x128xf32>
    %145 = tpu.concatenate %142, %144 in 0 : vector<2x128xf32>, vector<2x128xf32> -> vector<4x128xf32>
    %cst_52 = arith.constant dense<0.000000e+00> : vector<4x128xf32>
    %146 = tpu.matmul %145, %0, %cst_52 {dimension_numbers = #tpu.dot_dimension_numbers<[1], [0], [0], [1], [0, 0, 1, 1], [], []>} : vector<4x128xf32>, vector<128x128xf32>, vector<4x128xf32> -> vector<4x128xf32>
    %147 = vector.extract_strided_slice %146 {offsets = [0, 0], sizes = [2, 128], strides = [1, 1]} : vector<4x128xf32> to vector<2x128xf32>
    %148 = vector.extract_strided_slice %146 {offsets = [2, 0], sizes = [2, 128], strides = [1, 1]} : vector<4x128xf32> to vector<2x128xf32>
    %149 = arith.mulf %147, %147 : vector<2x128xf32>
    %150 = arith.subf %148, %149 : vector<2x128xf32>
    %cst_53 = arith.constant 0.000000e+00 : f32
    %151 = vector.broadcast %cst_53 : f32 to vector<2x128xf32>
    %152 = arith.maximumf %150, %151 : vector<2x128xf32>
    %cst_54 = arith.constant 9.99999974E-6 : f32
    %153 = vector.broadcast %cst_54 : f32 to vector<2x128xf32>
    %154 = arith.addf %152, %153 : vector<2x128xf32>
    %155 = math.rsqrt %154 : vector<2x128xf32>
    %156 = vector.shape_cast %147 : vector<2x128xf32> to vector<2x1x128xf32>
    %157 = vector.broadcast %156 : vector<2x1x128xf32> to vector<2x16x128xf32>
    %158 = arith.subf %141, %157 : vector<2x16x128xf32>
    %159 = vector.shape_cast %155 : vector<2x128xf32> to vector<2x1x128xf32>
    %160 = vector.broadcast %159 : vector<2x1x128xf32> to vector<2x16x128xf32>
    %161 = arith.mulf %158, %160 : vector<2x16x128xf32>
    %cst_55 = arith.constant 0.000000e+00 : f32
    %162 = vector.broadcast %cst_55 : f32 to vector<2x16x128xf32>
    %163 = arith.cmpf oge, %161, %162 : vector<2x16x128xf32>
    %cst_56 = arith.constant 0.00999999977 : f32
    %164 = vector.broadcast %cst_56 : f32 to vector<2x16x128xf32>
    %165 = arith.mulf %164, %161 : vector<2x16x128xf32>
    %166 = arith.select %163, %161, %165 : vector<2x16x128xi1>, vector<2x16x128xf32>
    %167 = vector.shape_cast %166 : vector<2x16x128xf32> to vector<32x128xf32>
    %168 = arith.truncf %167 : vector<32x128xf32> to vector<32x128xbf16>
    %cst_57 = arith.constant 0.000000e+00 : bf16
    %169 = vector.broadcast %cst_57 : bf16 to vector<1x128xbf16>
    %170 = vector.extract_strided_slice %168 {offsets = [0, 0], sizes = [31, 128], strides = [1, 1]} : vector<32x128xbf16> to vector<31x128xbf16>
    %171 = tpu.concatenate %169, %170 in 0 : vector<1x128xbf16>, vector<31x128xbf16> -> vector<32x128xbf16>
    %172 = vector.extract_strided_slice %168 {offsets = [1, 0], sizes = [31, 128], strides = [1, 1]} : vector<32x128xbf16> to vector<31x128xbf16>
    %173 = tpu.concatenate %172, %169 in 0 : vector<31x128xbf16>, vector<1x128xbf16> -> vector<32x128xbf16>
    %174 = tpu.iota {dimensions = array<i32: 0>} : vector<32x1xi32>
    %c16_i32_58 = arith.constant 16 : i32
    %c0_i32_59 = arith.constant 0 : i32
    %175 = arith.cmpi eq, %c16_i32_58, %c0_i32_59 : i32
    %c1_i32_60 = arith.constant 1 : i32
    %176 = arith.select %175, %c1_i32_60, %c16_i32_58 : i32
    %177 = vector.broadcast %176 : i32 to vector<32x1xi32>
    %178 = arith.remsi %174, %177 : vector<32x1xi32>
    %c0_i32_61 = arith.constant 0 : i32
    %179 = vector.broadcast %c0_i32_61 : i32 to vector<32x1xi32>
    %180 = arith.cmpi ne, %178, %179 : vector<32x1xi32>
    %c0_i32_62 = arith.constant 0 : i32
    %181 = vector.broadcast %c0_i32_62 : i32 to vector<32x1xi32>
    %182 = arith.cmpi slt, %178, %181 : vector<32x1xi32>
    %c0_i32_63 = arith.constant 0 : i32
    %183 = arith.cmpi slt, %176, %c0_i32_63 : i32
    %184 = vector.broadcast %183 : i1 to vector<32x1xi1>
    %185 = vector.broadcast %184 : vector<32x1xi1> to vector<32x1xi1>
    %186 = arith.xori %182, %185 : vector<32x1xi1>
    %187 = arith.andi %186, %180 : vector<32x1xi1>
    %188 = vector.broadcast %176 : i32 to vector<32x1xi32>
    %189 = arith.addi %178, %188 : vector<32x1xi32>
    %190 = arith.select %187, %189, %178 : vector<32x1xi1>, vector<32x1xi32>
    %c0_i32_64 = arith.constant 0 : i32
    %191 = vector.broadcast %c0_i32_64 : i32 to vector<32x1xi32>
    %192 = arith.cmpi eq, %190, %191 : vector<32x1xi32>
    %cst_65 = arith.constant 0.000000e+00 : bf16
    %193 = vector.broadcast %cst_65 : bf16 to vector<32x128xbf16>
    %194 = vector.shape_cast %192 : vector<32x1xi1> to vector<32x1xi1>
    %195 = vector.broadcast %194 : vector<32x1xi1> to vector<32x128xi1>
    %196 = arith.select %195, %193, %171 : vector<32x128xi1>, vector<32x128xbf16>
    %c16_i32_66 = arith.constant 16 : i32
    %c0_i32_67 = arith.constant 0 : i32
    %197 = arith.cmpi eq, %c16_i32_66, %c0_i32_67 : i32
    %c1_i32_68 = arith.constant 1 : i32
    %198 = arith.select %197, %c1_i32_68, %c16_i32_66 : i32
    %199 = vector.broadcast %198 : i32 to vector<32x1xi32>
    %200 = arith.remsi %174, %199 : vector<32x1xi32>
    %c0_i32_69 = arith.constant 0 : i32
    %201 = vector.broadcast %c0_i32_69 : i32 to vector<32x1xi32>
    %202 = arith.cmpi ne, %200, %201 : vector<32x1xi32>
    %c0_i32_70 = arith.constant 0 : i32
    %203 = vector.broadcast %c0_i32_70 : i32 to vector<32x1xi32>
    %204 = arith.cmpi slt, %200, %203 : vector<32x1xi32>
    %c0_i32_71 = arith.constant 0 : i32
    %205 = arith.cmpi slt, %198, %c0_i32_71 : i32
    %206 = vector.broadcast %205 : i1 to vector<32x1xi1>
    %207 = vector.broadcast %206 : vector<32x1xi1> to vector<32x1xi1>
    %208 = arith.xori %204, %207 : vector<32x1xi1>
    %209 = arith.andi %208, %202 : vector<32x1xi1>
    %210 = vector.broadcast %198 : i32 to vector<32x1xi32>
    %211 = arith.addi %200, %210 : vector<32x1xi32>
    %212 = arith.select %209, %211, %200 : vector<32x1xi1>, vector<32x1xi32>
    %c15_i32_72 = arith.constant 15 : i32
    %213 = vector.broadcast %c15_i32_72 : i32 to vector<32x1xi32>
    %214 = arith.cmpi eq, %212, %213 : vector<32x1xi32>
    %cst_73 = arith.constant 0.000000e+00 : bf16
    %215 = vector.broadcast %cst_73 : bf16 to vector<32x128xbf16>
    %216 = vector.shape_cast %214 : vector<32x1xi1> to vector<32x1xi1>
    %217 = vector.broadcast %216 : vector<32x1xi1> to vector<32x128xi1>
    %218 = arith.select %217, %215, %173 : vector<32x128xi1>, vector<32x128xbf16>
    %219 = tpu.concatenate %196, %168, %218 in 1 : vector<32x128xbf16>, vector<32x128xbf16>, vector<32x128xbf16> -> vector<32x384xbf16>
    %c0_74 = arith.constant 0 : index
    %c0_75 = arith.constant 0 : index
    %220 = vector.load %arg6[%c0_74, %c0_75] : memref<384x128xbf16, #tpu.memory_space<vmem>>, vector<384x128xbf16>
    %cst_76 = arith.constant dense<0.000000e+00> : vector<32x128xf32>
    %221 = tpu.matmul %219, %220, %cst_76 {dimension_numbers = #tpu.dot_dimension_numbers<[1], [0], [0], [1], [0, 0, 1, 1], [], []>} : vector<32x384xbf16>, vector<384x128xbf16>, vector<32x128xf32> -> vector<32x128xf32>
    %222 = vector.shape_cast %221 : vector<32x128xf32> to vector<2x16x128xf32>
    %cst_77 = arith.constant dense<0.000000e+00> : vector<2x128xf32>
    %223 = vector.multi_reduction <add>, %222, %cst_77 [1] : vector<2x16x128xf32> to vector<2x128xf32>
    %224 = arith.mulf %222, %222 : vector<2x16x128xf32>
    %cst_78 = arith.constant dense<0.000000e+00> : vector<2x128xf32>
    %225 = vector.multi_reduction <add>, %224, %cst_78 [1] : vector<2x16x128xf32> to vector<2x128xf32>
    %226 = tpu.concatenate %223, %225 in 0 : vector<2x128xf32>, vector<2x128xf32> -> vector<4x128xf32>
    %cst_79 = arith.constant dense<0.000000e+00> : vector<4x128xf32>
    %227 = tpu.matmul %226, %0, %cst_79 {dimension_numbers = #tpu.dot_dimension_numbers<[1], [0], [0], [1], [0, 0, 1, 1], [], []>} : vector<4x128xf32>, vector<128x128xf32>, vector<4x128xf32> -> vector<4x128xf32>
    %228 = vector.extract_strided_slice %227 {offsets = [0, 0], sizes = [2, 128], strides = [1, 1]} : vector<4x128xf32> to vector<2x128xf32>
    %229 = vector.extract_strided_slice %227 {offsets = [2, 0], sizes = [2, 128], strides = [1, 1]} : vector<4x128xf32> to vector<2x128xf32>
    %230 = arith.mulf %228, %228 : vector<2x128xf32>
    %231 = arith.subf %229, %230 : vector<2x128xf32>
    %cst_80 = arith.constant 0.000000e+00 : f32
    %232 = vector.broadcast %cst_80 : f32 to vector<2x128xf32>
    %233 = arith.maximumf %231, %232 : vector<2x128xf32>
    %cst_81 = arith.constant 9.99999974E-6 : f32
    %234 = vector.broadcast %cst_81 : f32 to vector<2x128xf32>
    %235 = arith.addf %233, %234 : vector<2x128xf32>
    %236 = math.rsqrt %235 : vector<2x128xf32>
    %237 = vector.shape_cast %228 : vector<2x128xf32> to vector<2x1x128xf32>
    %238 = vector.broadcast %237 : vector<2x1x128xf32> to vector<2x16x128xf32>
    %239 = arith.subf %222, %238 : vector<2x16x128xf32>
    %240 = vector.shape_cast %236 : vector<2x128xf32> to vector<2x1x128xf32>
    %241 = vector.broadcast %240 : vector<2x1x128xf32> to vector<2x16x128xf32>
    %242 = arith.mulf %239, %241 : vector<2x16x128xf32>
    %cst_82 = arith.constant 0.000000e+00 : f32
    %243 = vector.broadcast %cst_82 : f32 to vector<2x16x128xf32>
    %244 = arith.cmpf oge, %242, %243 : vector<2x16x128xf32>
    %cst_83 = arith.constant 0.00999999977 : f32
    %245 = vector.broadcast %cst_83 : f32 to vector<2x16x128xf32>
    %246 = arith.mulf %245, %242 : vector<2x16x128xf32>
    %247 = arith.select %244, %242, %246 : vector<2x16x128xi1>, vector<2x16x128xf32>
    %248 = vector.shape_cast %247 : vector<2x16x128xf32> to vector<32x128xf32>
    %249 = arith.truncf %248 : vector<32x128xf32> to vector<32x128xbf16>
    %c0_84 = arith.constant 0 : index
    %c0_85 = arith.constant 0 : index
    %250 = vector.load %arg8[%c0_84, %c0_85] : memref<32x128xbf16, #tpu.memory_space<vmem>>, vector<32x128xbf16>
    tpu.vector_store %arg8[%c0_84, %c0_85], %249 {strides = array<i32>} : memref<32x128xbf16, #tpu.memory_space<vmem>>, vector<32x128xbf16>,
    return
  }
  func.func @transform_0(%arg0: i32) -> (i32, i32) {
    %c0_i32 = arith.constant 0 : i32
    %c0_i32_0 = arith.constant 0 : i32
    return %arg0, %c0_i32 : i32, i32
  }
  func.func @transform_1(%arg0: i32) -> (i32, i32) {
    %c0_i32 = arith.constant 0 : i32
    %c0_i32_0 = arith.constant 0 : i32
    return %arg0, %c0_i32 : i32, i32
  }
  func.func @transform_2(%arg0: i32) -> (i32, i32) {
    %c0_i32 = arith.constant 0 : i32
    %c0_i32_0 = arith.constant 0 : i32
    %c0_i32_1 = arith.constant 0 : i32
    return %c0_i32, %c0_i32_0 : i32, i32
  }
  func.func @transform_3(%arg0: i32) -> (i32, i32) {
    %c0_i32 = arith.constant 0 : i32
    %c0_i32_0 = arith.constant 0 : i32
    %c0_i32_1 = arith.constant 0 : i32
    return %c0_i32, %c0_i32_0 : i32, i32
  }
  func.func @transform_4(%arg0: i32) -> (i32, i32) {
    %c0_i32 = arith.constant 0 : i32
    %c0_i32_0 = arith.constant 0 : i32
    %c0_i32_1 = arith.constant 0 : i32
    return %c0_i32, %c0_i32_0 : i32, i32
  }
  func.func @transform_5(%arg0: i32) -> (i32, i32) {
    %c0_i32 = arith.constant 0 : i32
    %c0_i32_0 = arith.constant 0 : i32
    %c0_i32_1 = arith.constant 0 : i32
    return %c0_i32, %c0_i32_0 : i32, i32
  }
  func.func @transform_6(%arg0: i32) -> (i32, i32) {
    %c0_i32 = arith.constant 0 : i32
    %c0_i32_0 = arith.constant 0 : i32
    %c0_i32_1 = arith.constant 0 : i32
    return %c0_i32, %c0_i32_0 : i32, i32
  }
  func.func @transform_7(%arg0: i32) -> (i32, i32) {
    %c0_i32 = arith.constant 0 : i32
    %c0_i32_0 = arith.constant 0 : i32
    return %arg0, %c0_i32 : i32, i32
  }
}

</mosaic_0001>

<bundles_post_ra>
// kernel: tpu_custom_call.1
= control target key start
LH: loop header
LB: loop body
LE: loop exit
PB: predicated region body
PF: predicated region fallthrough
CT: control target
= control target key end

     0   :  { %12 = vsyncpa [#allocation3], 0  ;;  %s3444_s0 = inlined_call_operand.hbm [shape: bf16[16,128], index: 0, kind: input, shape index: {}]   ;;  %s3445_s1 = inlined_call_operand.hbm [shape: bf16[32,128], index: 1, kind: input, shape index: {}]   ;;  %s3446_s2 = inlined_call_operand.hbm [shape: bf16[128,256], index: 2, kind: input, shape index: {}]   ;;  %s3447_s3 = inlined_call_operand.hbm [shape: f32[32,32], index: 3, kind: input, shape index: {}]   ;;  %s3448_s4 = inlined_call_operand.hbm [shape: bf16[768,128], index: 4, kind: input, shape index: {}]   ;;  %s3449_s5 = inlined_call_operand.hbm [shape: bf16[384,128], index: 5, kind: input, shape index: {}]   ;;  %s3450_s6 = inlined_call_operand.hbm [shape: f32[128,128], index: 6, kind: input, shape index: {}]   ;;  %s3451_s7 = inlined_call_operand.hbm [shape: bf16[32,128], index: 7, kind: output, shape index: {}]  }
   0x1   :  { %13 = vsyncpa [#allocation6], 0 }
   0x2   :  { %14 = vsyncpa [#allocation9], 0 }
   0x3   :  { %15 = vsyncpa [#allocation12], 0 }
   0x4   :  { %16 = vsyncpa [#allocation4], 0  ;;  %s2954_s24 = smov [#allocation5]   ;;  %s2768_s28 = scalar_lea.hbm %s3445_s1, 256 }
   0x5   :  { %s34_s25 = sshll.u32 %s2954_s24, 4  ;;  %p2769_p0 = scmp.ne.s32.totalorder %s3445_s1, %s2768_s28  ;;  %s35_s25 = int_to_ptr.vmem [resolvable:$true] %s34_s25 }
   0x6   :  { %p2772_p1 = scmp.lt.u32.totalorder %s2768_s28, %s3445_s1 }
   0x8   :  { %p2774_p2 = pnand %p2772_p1, %p2769_p0 }
   0xa   :  { %2777 = shalt.err (!%p2774_p2)
}
   0xb   :  { %s2778_s10 = scalar_lea.vmem %s35_s25, 256  ;;  %p2783_p4 = scmp.lt.s32.totalorder %s35_s25, %s35_s25 }
   0xc   :  { %p2779_p3 = scmp.ne.s32.totalorder %s35_s25, %s2778_s10  ;;  %p2784_p5 = scmp.lt.s32.totalorder %s2778_s10, %s2778_s10 }
   0xe   :  { %p2785_p6 = por %p2784_p5, %p2783_p4 }
  0x10   :  { %p2786_p7 = pnand %p2785_p6, %p2779_p3 }
  0x12   :  { %2789 = shalt.err (!%p2786_p7)
}
  0x13   :  { %s2955_s11 = smov 64   ;;  %s2956_s12 = smov 4  }
  0x14   :  { %40 = dma.hbm_to_vmem [thread:$0]  %s3445_s1, 256, %s35_s25, [#allocation6], %s2955_s11, %s2955_s11, %s2956_s12  }
  0x15   :  { %s2957_s15 = smov [#allocation8]   ;;  %s2958_s17 = smov [#allocation11]  }
  0x16   :  { %s58_s16 = sshll.u32 %s2957_s15, 4  ;;  %s82_s18 = sshll.u32 %s2958_s17, 4  ;;  %s59_s16 = int_to_ptr.vmem [resolvable:$true] %s58_s16  ;;  %s83_s18 = int_to_ptr.vmem [resolvable:$true] %s82_s18 }
  0x17   :  { %s2790_s21 = scalar_lea.hbm %s3447_s3, 512 }
  0x18   :  { %p2791_p8 = scmp.ne.s32.totalorder %s3447_s3, %s2790_s21  ;;  %p2794_p9 = scmp.lt.u32.totalorder %s2790_s21, %s3447_s3 }
  0x1a   :  { %p2796_p10 = pnand %p2794_p9, %p2791_p8 }
  0x1c   :  { %2799 = shalt.err (!%p2796_p10)
}
  0x1d   :  { %s2800_s1 = scalar_lea.vmem %s59_s16, 512  ;;  %p2805_p12 = scmp.lt.s32.totalorder %s59_s16, %s59_s16 }
  0x1e   :  { %p2801_p11 = scmp.ne.s32.totalorder %s59_s16, %s2800_s1  ;;  %p2806_p13 = scmp.lt.s32.totalorder %s2800_s1, %s2800_s1 }
  0x20   :  { %p2807_p0 = por %p2806_p13, %p2805_p12 }
  0x22   :  { %p2808_p1 = pnand %p2807_p0, %p2801_p11 }
  0x24   :  { %2811 = shalt.err (!%p2808_p1)
}
  0x25   :  { %s2959_s25 = smov 128   ;;  %s2960_s27 = smov 8  }
  0x26   :  { %64 = dma.hbm_to_vmem [thread:$0]  %s3447_s3, 512, %s59_s16, [#allocation9], %s2959_s25, %s2959_s25, %s2960_s27  }
  0x27   :  { %s2812_s9 = scalar_lea.hbm %s3449_s5, 3072 }
  0x28   :  { %p2813_p2 = scmp.ne.s32.totalorder %s3449_s5, %s2812_s9  ;;  %p2816_p3 = scmp.lt.u32.totalorder %s2812_s9, %s3449_s5 }
  0x2a   :  { %p2818_p4 = pnand %p2816_p3, %p2813_p2 }
  0x2c   :  { %2821 = shalt.err (!%p2818_p4)
}
  0x2d   :  { %s2822_s17 = scalar_lea.vmem %s83_s18, 3072  ;;  %p2827_p6 = scmp.lt.s32.totalorder %s83_s18, %s83_s18 }
  0x2e   :  { %p2823_p5 = scmp.ne.s32.totalorder %s83_s18, %s2822_s17  ;;  %p2828_p7 = scmp.lt.s32.totalorder %s2822_s17, %s2822_s17 }
  0x30   :  { %p2829_p8 = por %p2828_p7, %p2827_p6 }
  0x32   :  { %p2830_p9 = pnand %p2829_p8, %p2823_p5 }
  0x34   :  { %2833 = shalt.err (!%p2830_p9)
}
  0x35   :  { %88 = dma.hbm_to_vmem [thread:$0]  %s3449_s5, 3072, %s83_s18, [#allocation12], %s2955_s11, %s2955_s11, %s2956_s12  }
  0x36   :  { %s2961_s19 = smov [#allocation2]   ;;  %s2962_s21 = smov [#allocation7]  }
  0x37   :  { %s22_s20 = sshll.u32 %s2961_s19, 4  ;;  %s46_s22 = sshll.u32 %s2962_s21, 4  ;;  %s23_s20 = int_to_ptr.vmem [resolvable:$true] %s22_s20  ;;  %s47_s22 = int_to_ptr.vmem [resolvable:$true] %s46_s22 }
  0x38   :  { %s2834_s26 = scalar_lea.hbm %s3444_s0, 128 }
  0x39   :  { %p2835_p10 = scmp.ne.s32.totalorder %s3444_s0, %s2834_s26  ;;  %p2838_p11 = scmp.lt.u32.totalorder %s2834_s26, %s3444_s0 }
  0x3b   :  { %p2840_p12 = pnand %p2838_p11, %p2835_p10 }
  0x3d   :  { %2843 = shalt.err (!%p2840_p12)
}
  0x3e   :  { %s2844_s5 = scalar_lea.vmem %s23_s20, 128  ;;  %p2849_p0 = scmp.lt.s32.totalorder %s23_s20, %s23_s20 }
  0x3f   :  { %p2845_p13 = scmp.ne.s32.totalorder %s23_s20, %s2844_s5  ;;  %p2850_p1 = scmp.lt.s32.totalorder %s2844_s5, %s2844_s5 }
  0x41   :  { %p2851_p2 = por %p2850_p1, %p2849_p0 }
  0x43   :  { %p2852_p3 = pnand %p2851_p2, %p2845_p13 }
  0x45   :  { %2855 = shalt.err (!%p2852_p3)
}
  0x46   :  { %28 = dma.hbm_to_vmem [thread:$0]  %s3444_s0, 128, %s23_s20, [#allocation3], %s2955_s11, %s2955_s11, %s2956_s12  }
  0x47   :  { %s2856_s13 = scalar_lea.hbm %s3446_s2, 2048 }
  0x48   :  { %p2857_p4 = scmp.ne.s32.totalorder %s3446_s2, %s2856_s13  ;;  %p2860_p5 = scmp.lt.u32.totalorder %s2856_s13, %s3446_s2 }
  0x4a   :  { %p2862_p6 = pnand %p2860_p5, %p2857_p4 }
  0x4c   :  { %2865 = shalt.err (!%p2862_p6)
}
  0x4d   :  { %s2866_s16 = scalar_lea.vmem %s47_s22, 2048  ;;  %p2871_p8 = scmp.lt.s32.totalorder %s47_s22, %s47_s22 }
  0x4e   :  { %p2867_p7 = scmp.ne.s32.totalorder %s47_s22, %s2866_s16  ;;  %p2872_p9 = scmp.lt.s32.totalorder %s2866_s16, %s2866_s16 }
  0x50   :  { %p2873_p10 = por %p2872_p9, %p2871_p8 }
  0x52   :  { %p2874_p11 = pnand %p2873_p10, %p2867_p7 }
  0x54   :  { %2877 = shalt.err (!%p2874_p11)
}
  0x55   :  { %52 = dma.hbm_to_vmem [thread:$0]  %s3446_s2, 2048, %s47_s22, [#allocation6], %s2959_s25, %s2959_s25, %s2960_s27  }
  0x56   :  { %s2963_s20 = smov [#allocation10]   ;;  %s2964_s23 = smov [#allocation13]  }
  0x57   :  { %s70_s21 = sshll.u32 %s2963_s20, 4  ;;  %s94_s24 = sshll.u32 %s2964_s23, 4  ;;  %s71_s21 = int_to_ptr.vmem [resolvable:$true] %s70_s21  ;;  %s95_s24 = int_to_ptr.vmem [resolvable:$true] %s94_s24 }
  0x58   :  { %s2878_s28 = scalar_lea.hbm %s3448_s4, 6144 }
  0x59   :  { %p2879_p12 = scmp.ne.s32.totalorder %s3448_s4, %s2878_s28  ;;  %p2882_p13 = scmp.lt.u32.totalorder %s2878_s28, %s3448_s4 }
  0x5b   :  { %p2884_p0 = pnand %p2882_p13, %p2879_p12 }
  0x5d   :  { %2887 = shalt.err (!%p2884_p0)
}
  0x5e   :  { %s2888_s2 = scalar_lea.vmem %s71_s21, 6144  ;;  %p2893_p2 = scmp.lt.s32.totalorder %s71_s21, %s71_s21 }
  0x5f   :  { %p2889_p1 = scmp.ne.s32.totalorder %s71_s21, %s2888_s2  ;;  %p2894_p3 = scmp.lt.s32.totalorder %s2888_s2, %s2888_s2 }
  0x61   :  { %p2895_p4 = por %p2894_p3, %p2893_p2 }
  0x63   :  { %p2896_p5 = pnand %p2895_p4, %p2889_p1 }
  0x65   :  { %2899 = shalt.err (!%p2896_p5)
}
  0x66   :  { %76 = dma.hbm_to_vmem [thread:$0]  %s3448_s4, 6144, %s71_s21, [#allocation9], %s2955_s11, %s2955_s11, %s2956_s12  }
  0x67   :  { %s2900_s13 = scalar_lea.hbm %s3450_s6, 2048 }
  0x68   :  { %p2901_p6 = scmp.ne.s32.totalorder %s3450_s6, %s2900_s13  ;;  %p2904_p7 = scmp.lt.u32.totalorder %s2900_s13, %s3450_s6 }
  0x6a   :  { %p2906_p8 = pnand %p2904_p7, %p2901_p6 }
  0x6c   :  { %2909 = shalt.err (!%p2906_p8)
}
  0x6d   :  { %s2910_s16 = scalar_lea.vmem %s95_s24, 2048  ;;  %p2915_p10 = scmp.lt.s32.totalorder %s95_s24, %s95_s24 }
  0x6e   :  { %p2911_p9 = scmp.ne.s32.totalorder %s95_s24, %s2910_s16  ;;  %p2916_p11 = scmp.lt.s32.totalorder %s2910_s16, %s2910_s16 }
  0x70   :  { %p2917_p12 = por %p2916_p11, %p2915_p10 }
  0x72   :  { %p2918_p13 = pnand %p2917_p12, %p2911_p9 }
  0x74   :  { %2921 = shalt.err (!%p2918_p13)
}
  0x75   :  { %100 = dma.hbm_to_vmem [thread:$0]  %s3450_s6, 2048, %s95_s24, [#allocation12], %s2959_s25, %s2959_s25, %s2960_s27  }
  0x76   :  { %2944 = dma.done.wait [#allocation3], 128  }
  0x77   :  { %2945 = vsyncadd [#allocation3], 4294967168 }
  0x78   :  { %2946 = dma.done.wait [#allocation6], 2304  }
  0x79   :  { %2947 = vsyncadd [#allocation6], 4294964992 }
  0x7a   :  { %2948 = dma.done.wait [#allocation9], 6656  }
  0x7b   :  { %2949 = vsyncadd [#allocation9], 4294960640 }
  0x7c   :  { %2950 = dma.done.wait [#allocation12], 5120  }
  0x7d   :  { %2951 = vsyncadd [#allocation12], 4294962176  ;;  %v2965_v0 = vmov 0   ;;  %v2663_v1 = vld [vmem:[#allocation7 + $0x4] ss:$8 sps:$4 sm:$0xff]   ;;  %vm292_vm0 = vcmask 261120  }
  0x7e   :  { %277 = vmatprep.mubr.bf16.mxu0 %v2965_v0  ;;  %v2665_v2 = vld [vmem:[#allocation7] ss:$8 sps:$4 sm:$0xff]   ;;  %245 = vmatprep.subr.bf16.mxu0 %v2663_v1  ;;  %v2666_v3 = vld [vmem:[#allocation7 + $0x14] ss:$8 sps:$4 sm:$0xff]   ;;  %v2668_v4 = vld [vmem:[#allocation7 + $0x10] ss:$8 sps:$4 sm:$0xff]  }
  0x7f   :  { %246 = vmatpush1.bf16.msra.mxu0 %v2665_v2  ;;  %v2669_v5 = vld [vmem:[#allocation7 + $0x24] ss:$8 sps:$4 sm:$0xff]   ;;  %v2671_v6 = vld [vmem:[#allocation7 + $0x20] ss:$8 sps:$4 sm:$0xff]   ;;  %v2672_v7 = vld [vmem:[#allocation7 + $0x34] ss:$8 sps:$4 sm:$0xff]  }
  0x80   :  { %247 = vmatprep.subr.bf16.mxu0 %v2666_v3  ;;  %v2674_v8 = vld [vmem:[#allocation7 + $0x30] ss:$8 sps:$4 sm:$0xff]   ;;  %v2675_v9 = vld [vmem:[#allocation7 + $0x44] ss:$8 sps:$4 sm:$0xff]   ;;  %v2677_v10 = vld [vmem:[#allocation7 + $0x40] ss:$8 sps:$4 sm:$0xff]  }
  0x81   :  { %v2678_v11 = vld [vmem:[#allocation7 + $0x54] ss:$8 sps:$4 sm:$0xff]   ;;  %v2680_v12 = vld [vmem:[#allocation7 + $0x50] ss:$8 sps:$4 sm:$0xff]   ;;  %v2681_v13 = vld [vmem:[#allocation7 + $0x64] ss:$8 sps:$4 sm:$0xff]  }
  0x82   :  { %v2683_v14 = vld [vmem:[#allocation7 + $0x60] ss:$8 sps:$4 sm:$0xff]   ;;  %v2684_v15 = vld [vmem:[#allocation7 + $0x74] ss:$8 sps:$4 sm:$0xff]   ;;  %v2686_v16 = vld [vmem:[#allocation7 + $0x70] ss:$8 sps:$4 sm:$0xff]  }
  0x83   :  { %248 = vmatpush1.bf16.msra.mxu0 %v2668_v4  ;;  %v2687_v17 = vld [vmem:[#allocation2] sm:$0xff]   ;;  %v288_v18 = vld [vmem:[#allocation8] sm:$0xff]  ;;  %v290_v29 = vld [vmem:[#allocation8 + $0x10] sm:$0xff]  ;;  %v2966_v30 = vmov 0.0|0.0   ;;  %vm2967_vm1 = vmmov 0   ;;  %v2968_v53 = vmov 0.0  }
  0x84   :  { %249 = vmatprep.subr.bf16.mxu0 %v2669_v5  ;;  %2435 = vmatprep.mubr.msk.f32.mxu1 %vm292_vm0, %v288_v18  ;;  %v125_v25 = vld [vmem:[#allocation13] sm:$0xff]  ;;  %v126_v26 = vld [vmem:[#allocation13 + $0x8] sm:$0xff]  ;;  %v127_v31 = vld [vmem:[#allocation13 + $0x10] sm:$0xff]  ;;  %vm424_vm2 = vcmask 1041409   ;;  %vm429_vm3 = vcmask 1043459   ;;  %vm432_vm4 = vcmask 1041408  }
  0x85   :  { %v289_v27 = vld [vmem:[#allocation8 + $0x8] sm:$0xff]  ;;  %v3118_v28 = vpack.c.bf16 %v126_v26, %v125_v25  ;;  %v128_v32 = vld [vmem:[#allocation13 + $0x18] sm:$0xff]  ;;  %v129_v35 = vld [vmem:[#allocation13 + $0x20] sm:$0xff]  ;;  %vm616_vm8 = vsmask.f32 256  ;;  %vm634_vm9 = vcmask 1040384  }
  0x86   :  { %v291_v33 = vld [vmem:[#allocation8 + $0x18] sm:$0xff]  ;;  %v3124_v34 = vpack.c.bf16 %v128_v32, %v127_v31  ;;  %v130_v36 = vld [vmem:[#allocation13 + $0x28] sm:$0xff]  ;;  %v131_v38 = vld [vmem:[#allocation13 + $0x30] sm:$0xff]  ;;  %s2970_s6 = smov [#allocation14]  }
  0x87   :  { %250 = vmatpush1.bf16.msra.mxu0 %v2671_v6  ;;  %v3130_v37 = vpack.c.bf16 %v130_v36, %v129_v35  ;;  %v132_v39 = vld [vmem:[#allocation13 + $0x38] sm:$0xff]  ;;  %v133_v41 = vld [vmem:[#allocation13 + $0x40] sm:$0xff]  ;;  %v134_v42 = vld [vmem:[#allocation13 + $0x48] sm:$0xff]  ;;  %s2085_s25 = sshll.u32 %s2970_s6, 4  ;;  %s2086_s25 = int_to_ptr.vmem [resolvable:$true] %s2085_s25 }
  0x88   :  { %251 = vmatprep.subr.bf16.mxu0 %v2672_v7  ;;  %v3134_v40 = vpack.c.bf16 %v132_v39, %v131_v38  ;;  %v3138_v43 = vpack.c.bf16 %v134_v42, %v133_v41  ;;  %v135_v44 = vld [vmem:[#allocation13 + $0x50] sm:$0xff]  ;;  %v136_v45 = vld [vmem:[#allocation13 + $0x58] sm:$0xff]  ;;  %v137_v47 = vld [vmem:[#allocation13 + $0x60] sm:$0xff]  ;;  %s2922_s27 = scalar_lea.vmem %s2086_s25, 256  ;;  %p2927_p1 = scmp.lt.s32.totalorder %s2086_s25, %s2086_s25 }
  0x89   :  { %v3142_v46 = vpack.c.bf16 %v136_v45, %v135_v44  ;;  %v138_v48 = vld [vmem:[#allocation13 + $0x68] sm:$0xff]  ;;  %v139_v50 = vld [vmem:[#allocation13 + $0x70] sm:$0xff]  ;;  %v140_v51 = vld [vmem:[#allocation13 + $0x78] sm:$0xff]  ;;  %p2923_p0 = scmp.ne.s32.totalorder %s2086_s25, %s2922_s27  ;;  %p2928_p2 = scmp.lt.s32.totalorder %s2922_s27, %s2922_s27 }
  0x8a   :  { %v3146_v49 = vpack.c.bf16 %v138_v48, %v137_v47  ;;  %v3150_v52 = vpack.c.bf16 %v140_v51, %v139_v50  ;;  %v2688_v54 = vld [vmem:[#allocation10 + $0x40] sm:$0xff]   ;;  %v2690_v56 = vld [vmem:[#allocation10 + $0x48] sm:$0xff]   ;;  %v2692_v58 = vld [vmem:[#allocation10 + $0x50] sm:$0xff]   ;;  %v516_v47 = vlaneseq }
  0x8b   :  { %252 = vmatpush1.bf16.msra.mxu0 %v2674_v8  ;;  %v2689_v55 = vld [vmem:[#allocation10] sm:$0xff]   ;;  %v2691_v57 = vld [vmem:[#allocation10 + $0x8] sm:$0xff]   ;;  %v2693_v59 = vld [vmem:[#allocation10 + $0x10] sm:$0xff]   ;;  %p2929_p3 = por %p2928_p2, %p2927_p1 }
  0x8c   :  { %253 = vmatprep.subr.bf16.mxu0 %v2675_v9  ;;  %v2694_v60 = vld [vmem:[#allocation10 + $0x58] sm:$0xff]   ;;  %v2696_v62 = vld [vmem:[#allocation10 + $0x60] sm:$0xff]   ;;  %v2698_v48 = vld [vmem:[#allocation10 + $0x68] sm:$0xff]   ;;  %v3178_v51 = vshrl.u32 %v516_v47, 7 }
  0x8d   :  { %v2695_v61 = vld [vmem:[#allocation10 + $0x18] sm:$0xff]   ;;  %v2697_v63 = vld [vmem:[#allocation10 + $0x20] sm:$0xff]   ;;  %v2699_v50 = vld [vmem:[#allocation10 + $0x28] sm:$0xff]   ;;  %p2930_p4 = pnand %p2929_p3, %p2923_p0 }
  0x8e   :  { %vm714_vm5 = vmpackc.low %vm2967_vm1, %vm2967_vm1  ;;  %v2728_v47 = vld [vmem:[#allocation10 + $0x128] sm:$0xff]  }
  0x8f   :  { %254 = vmatpush1.bf16.msra.mxu0 %v2677_v10  ;;  %vm3201_vm10 = vmand %vm634_vm9, %vm616_vm8 }
  0x90   :  { %255 = vmatprep.subr.bf16.mxu0 %v2678_v11 }
  0x93   :  { %256 = vmatpush1.bf16.msra.mxu0 %v2680_v12 }
  0x94   :  { %257 = vmatprep.subr.bf16.mxu0 %v2681_v13 }
  0x97   :  { %258 = vmatpush1.bf16.msra.mxu0 %v2683_v14 }
  0x98   :  { %259 = vmatprep.subr.bf16.mxu0 %v2684_v15 }
  0x9b   :  { %260 = vmatpush1.bf16.msra.mxu0 %v2686_v16 }
  0x9c   :  { %2271 = vmatprep.subr.bf16.mxu0 %v2688_v54  ;;  %v2700_v54 = vld [vmem:[#allocation10 + $0x70] sm:$0xff]  }
  0x9e   :  { %278 = vmatmul.mubr.bf16.vlgmr.msra.gmra.mrb[0].mxu0 %v2687_v17 }
  0x9f   :  { %2272 = vmatpush3.bf16.msra.mxu0 %v2689_v55  ;;  %v2701_v55 = vld [vmem:[#allocation10 + $0x30] sm:$0xff]  }
  0xa0   :  { %2273 = vmatprep.subr.bf16.mxu0 %v2690_v56  ;;  %v3182_v56 = vld [vmem:[#allocation5] sm:$0xff]  }
  0xa1   :  { %1209 = vmatprep.mubr.bf16.mxu0 %v3182_v56 }
  0xa3   :  { %2274 = vmatpush3.bf16.msra.mxu0 %v2691_v57  ;;  %v657_v57 = vand.u32 15, %v3178_v51 }
  0xa4   :  { %2275 = vmatprep.subr.bf16.mxu0 %v2692_v58  ;;  %v618_v58 = vshrl.u32 %v3182_v56, 16 }
  0xa5   :  { %vm701_vm6 = vcmp.eq.s32.totalorder %v657_v57, 0  ;;  %v2731_v57 = vld [vmem:[#allocation10 + $0x170] sm:$0xff]  }
  0xa6   :  { %vm713_vm7 = vmpackc.low %vm701_vm6, %vm701_vm6 }
  0xa7   :  { %2276 = vmatpush3.bf16.msra.mxu0 %v2693_v59  ;;  %v3188_v59 = vsel %vm714_vm5, 65537, %v2965_v0 }
  0xa8   :  { %2277 = vmatprep.subr.bf16.mxu0 %v2694_v60  ;;  %v2702_v60 = vld [vmem:[#allocation10 + $0x78] sm:$0xff]  }
  0xab   :  { %2278 = vmatpush3.bf16.msra.mxu0 %v2695_v61  ;;  %v2703_v61 = vld [vmem:[#allocation10 + $0x38] sm:$0xff]  }
  0xac   :  { %2279 = vmatprep.subr.bf16.mxu0 %v2696_v62  ;;  %v621_v62 = vshll.u32 %v3182_v56, 16 }
  0xaf   :  { %2280 = vmatpush3.bf16.msra.mxu0 %v2697_v63  ;;  %v3193_v63 = vrot.slane %v618_v58, 7 }
  0xb0   :  { %2281 = vmatprep.subr.bf16.mxu0 %v2698_v48 }
  0xb3   :  { %2282 = vmatpush3.bf16.msra.mxu0 %v2699_v50 }
  0xb4   :  { %2283 = vmatprep.subr.bf16.mxu0 %v2700_v54 }
  0xb7   :  { %2284 = vmatpush3.bf16.msra.mxu0 %v2701_v55  ;;  %v2730_v55 = vld [vmem:[#allocation10 + $0xf0] sm:$0xff]  }
  0xb8   :  { %2285 = vmatprep.subr.bf16.mxu0 %v2702_v60  ;;  %v2732_v60 = vld [vmem:[#allocation10 + $0xb0] sm:$0xff]  }
  0xbb   :  { %2286 = vmatpush3.bf16.msra.mxu0 %v2703_v61 }
 0x171   :  { %v279_v19 = vpop.f32.mrb[0].mxu0 }
 0x172   :  { %v281_v20 = vpop.f32.mrb[1].mxu0 }
 0x173   :  { %v283_v21 = vpop.f32.mrb[2].mxu0 }
 0x174   :  { %v2566_v22 = vpack.c.bf16 %v283_v21, %v279_v19  ;;  %v285_v23 = vpop.f32.mrb[3].mxu0 }
 0x175   :  { %v2570_v24 = vpack.c.bf16 %v285_v23, %v281_v20 }
 0x176   :  { %2567 = vmatprep.subr.bf16.mxu1 %v2566_v22 }
 0x177   :  { %2569 = vmatpush3.bf16.msra.mxu1 %v2566_v22 }
 0x178   :  { %2571 = vmatprep.subr.bf16.mxu1 %v2570_v24 }
 0x17b   :  { %2573 = vmatpush3.bf16.msra.mxu1 %v2570_v24 }
 0x17c   :  { %2574 = vmatprep.subr.bf16.mxu1 %v2966_v30 }
 0x17e   :  { %2436 = vmatmul.mubr.msk.f32.vlgmr.msra.gmra.mrb[0].mxu1 %vm292_vm0, %v289_v27 }
 0x17f   :  { %2438 = vmatprep.mubr.msk.f32.mxu1 %vm292_vm0, %v290_v29  ;;  %2576 = vmatpush3.bf16.msra.mxu1 %v3118_v28 }
 0x180   :  { %2577 = vmatprep.subr.bf16.mxu1 %v2966_v30 }
 0x182   :  { %2439 = vmatmul.mubr.msk.f32.gmra.mrb[2].mxu1 %vm292_vm0, %v291_v33 }
 0x183   :  { %2579 = vmatpush3.bf16.msra.mxu1 %v3124_v34  ;;  %2473 = vmatprep.mubr.msk.f32.mxu1 %vm2967_vm1, %v2968_v53 }
 0x184   :  { %2580 = vmatprep.subr.bf16.mxu1 %v2966_v30 }
 0x187   :  { %2582 = vmatpush3.bf16.msra.mxu1 %v3130_v37 }
 0x188   :  { %2583 = vmatprep.subr.bf16.mxu1 %v2966_v30 }
 0x18b   :  { %2585 = vmatpush3.bf16.msra.mxu1 %v3134_v40 }
 0x18c   :  { %2586 = vmatprep.subr.bf16.mxu1 %v2966_v30 }
 0x18f   :  { %2588 = vmatpush3.bf16.msra.mxu1 %v3138_v43 }
 0x190   :  { %2589 = vmatprep.subr.bf16.mxu1 %v2966_v30 }
 0x193   :  { %2591 = vmatpush3.bf16.msra.mxu1 %v3142_v46 }
 0x194   :  { %2592 = vmatprep.subr.bf16.mxu1 %v2966_v30 }
 0x197   :  { %2594 = vmatpush3.bf16.msra.mxu1 %v3146_v49 }
 0x198   :  { %2595 = vmatprep.subr.bf16.mxu1 %v2966_v30 }
 0x19b   :  { %2597 = vmatpush3.bf16.msra.mxu1 %v3150_v52 }
 0x251   :  { %v3155_v1 = vpop.f32.mrb[0].mxu1 }
 0x252   :  { %v405_v2 = vmul.f32 %v3155_v1, %v3155_v1  ;;  %v3159_v3 = vpop.f32.mrb[1].mxu1 }
 0x253   :  { %v390_v4 = vadd.f32 %v3155_v1, %v3159_v3  ;;  %v404_v5 = vmul.f32 %v3159_v3, %v3159_v3 }
 0x255   :  { %v391_v6 = vrot.slane %v390_v4, 4  ;;  %v408_v7 = vadd.f32 %v405_v2, %v404_v5  ;;  %v3165_v8 = vpop.f32.mrb[2].mxu1  ;;  %v717_v2 = vsel %vm713_vm7, 65537, %v2965_v0  ;;  %vm637_vm7 = vsmask.f32 7424 }
 0x256   :  { %v407_v9 = vmul.f32 %v3165_v8, %v3165_v8  ;;  %v3169_v10 = vpop.f32.mrb[3].mxu1  ;;  %v2123_v5 = vcombine.low %v717_v2, %v3188_v59 }
 0x257   :  { %v392_v11 = vadd.f32 %v391_v6, %v390_v4  ;;  %v409_v12 = vrot.slane %v408_v7, 4  ;;  %v397_v13 = vadd.f32 %v3165_v8, %v3169_v10  ;;  %v406_v14 = vmul.f32 %v3169_v10, %v3169_v10 }
 0x258   :  { %v623_v4 = vor.u32 %v621_v62, %v3193_v63  ;;  %vm3207_vm11 = vcmp.eq.s16.totalorder %v2123_v5, 0  ;;  %v2734_v5 = vld [vmem:[#allocation10 + $0xf8] sm:$0xff]  }
 0x259   :  { %v393_v15 = vrot.slane %v392_v11, 2  ;;  %v410_v16 = vadd.f32 %v409_v12, %v408_v7  ;;  %v398_v17 = vrot.slane %v397_v13, 4  ;;  %v415_v18 = vadd.f32 %v407_v9, %v406_v14  ;;  %v2705_v7 = vld [vmem:[#allocation10 + $0xc0] sm:$0xff]  }
 0x25a   :  { %v2706_v9 = vld [vmem:[#allocation10 + $0x140] sm:$0xff]   ;;  %2299 = vmatprep.subr.bf16.mxu1 %v2705_v7  ;;  %v650_v7 = vadd.s32 8, %v3178_v51 }
 0x25b   :  { %v394_v19 = vadd.f32 %v393_v15, %v392_v11  ;;  %v411_v20 = vrot.slane %v410_v16, 2  ;;  %v399_v21 = vadd.f32 %v398_v17, %v397_v13  ;;  %v416_v22 = vrot.slane %v415_v18, 4  ;;  %v2707_v13 = vld [vmem:[#allocation10 + $0x80] sm:$0xff]   ;;  %2327 = vmatprep.subr.bf16.mxu0 %v2706_v9  ;;  %v2709_v15 = vld [vmem:[#allocation10 + $0xc8] sm:$0xff]   ;;  %v2735_v9 = vld [vmem:[#allocation10 + $0x178] sm:$0xff]  }
 0x25c   :  { %v636_v11 = vsel %vm3201_vm10, 0, %v623_v4  ;;  %v2708_v14 = vld [vmem:[#allocation10 + $0x100] sm:$0xff]   ;;  %v2711_v17 = vld [vmem:[#allocation10 + $0x88] sm:$0xff]   ;;  %v2733_v4 = vld [vmem:[#allocation10 + $0x130] sm:$0xff]  }
 0x25d   :  { %v412_v23 = vadd.f32 %v411_v20, %v410_v16  ;;  %v400_v24 = vrot.slane %v399_v21, 2  ;;  %v417_v25 = vadd.f32 %v416_v22, %v415_v18  ;;  %v395_v26 = vrot.slane %v394_v19, 1  ;;  %2176 = vmatmul.mubr.msk.bf16.vlgmr.msra.gmra.mrb[4].mxu0 %vm3207_vm11, %v636_v11  ;;  %v2710_v16 = vld [vmem:[#allocation10 + $0x148] sm:$0xff]   ;;  %v2714_v20 = vld [vmem:[#allocation10 + $0x150] sm:$0xff]  }
 0x25e   :  { %2328 = vmatpush3.bf16.msra.mxu0 %v2708_v14  ;;  %v2712_v18 = vld [vmem:[#allocation10 + $0x108] sm:$0xff]   ;;  %v2716_v22 = vld [vmem:[#allocation10 + $0x110] sm:$0xff]   ;;  %v664_v11 = vand.u32 15, %v650_v7  ;;  %v2736_v14 = vld [vmem:[#allocation10 + $0xb8] sm:$0xff]  }
 0x25f   :  { %v401_v27 = vadd.f32 %v400_v24, %v399_v21  ;;  %v418_v29 = vrot.slane %v417_v25, 2  ;;  %v413_v31 = vrot.slane %v412_v23, 1  ;;  %v396_v35 = vadd.f32 %v395_v26, %v394_v19  ;;  %2329 = vmatprep.subr.bf16.mxu0 %v2710_v16  ;;  %v2713_v19 = vld [vmem:[#allocation10 + $0xd0] sm:$0xff]   ;;  %v2718_v24 = vld [vmem:[#allocation10 + $0x158] sm:$0xff]  }
 0x260   :  { %v2715_v21 = vld [vmem:[#allocation10 + $0x90] sm:$0xff]   ;;  %v2720_v26 = vld [vmem:[#allocation10 + $0x118] sm:$0xff]   ;;  %vm732_vm15 = vcmp.eq.s32.totalorder %v664_v11, 15 }
 0x261   :  { %v402_v32 = vrot.slane %v401_v27, 1  ;;  %v419_v33 = vadd.f32 %v418_v29, %v417_v25  ;;  %v414_v39 = vadd.f32 %v413_v31, %v412_v23  ;;  %v2717_v23 = vld [vmem:[#allocation10 + $0xd8] sm:$0xff]   ;;  %v2721_v29 = vld [vmem:[#allocation10 + $0xe0] sm:$0xff]   ;;  %vm744_vm0 = vmpackc.low %vm732_vm15, %vm732_vm15 }
 0x262   :  { %2330 = vmatpush3.bf16.msra.mxu0 %v2712_v18  ;;  %v2719_v25 = vld [vmem:[#allocation10 + $0x98] sm:$0xff]   ;;  %v2722_v31 = vld [vmem:[#allocation10 + $0x160] sm:$0xff]  }
 0x263   :  { %v403_v36 = vadd.f32 %v402_v32, %v401_v27  ;;  %v420_v38 = vrot.slane %v419_v33, 1  ;;  %2331 = vmatprep.subr.bf16.mxu0 %v2714_v20  ;;  %v651_v27 = vadd.s32 16, %v3178_v51  ;;  %v3214_v32 = vld [vmem:[#allocation5 + $0x8] sm:$0xff]  }
 0x264   :  { %1217 = vmatprep.mubr.bf16.mxu0 %v3214_v32 }
 0x265   :  { %v421_v41 = vadd.f32 %v420_v38, %v419_v33  ;;  %v425_v42 = vsel %vm424_vm2, %v403_v36, %v396_v35  ;;  %v2723_v33 = vld [vmem:[#allocation10 + $0xa0] sm:$0xff]   ;;  %v671_v36 = vand.u32 15, %v651_v27  ;;  %v625_v38 = vshrl.u32 %v3214_v32, 16 }
 0x266   :  { %2332 = vmatpush3.bf16.msra.mxu0 %v2716_v22  ;;  %v2724_v35 = vld [vmem:[#allocation10 + $0x120] sm:$0xff]  }
 0x267   :  { %v430_v44 = vsel %vm429_vm3, %v421_v41, %v414_v39  ;;  %2333 = vmatprep.subr.bf16.mxu0 %v2718_v24  ;;  %vm703_vm12 = vcmp.eq.s32.totalorder %v671_v36, 0  ;;  %v2725_v39 = vld [vmem:[#allocation10 + $0xe8] sm:$0xff]   ;;  %v2969_v24 = vmov 1966171168  }
 0x268   :  { %v433_v45 = vsel %vm432_vm4, %v425_v42, %v430_v44  ;;  %v2726_v41 = vld [vmem:[#allocation10 + $0x168] sm:$0xff]   ;;  %v628_v42 = vshll.u32 %v3214_v32, 16  ;;  %v627_v44 = vrot.slane %v625_v38, 7  ;;  %vm715_vm13 = vmpackc.low %vm703_vm12, %vm703_vm12 }
 0x269   :  { %2474 = vmatmul.mubr.f32.vlgmr.msra.gmra.mrb[4].mxu1 %v433_v45  ;;  %v2727_v45 = vld [vmem:[#allocation10 + $0xa8] sm:$0xff]   ;;  %v719_v48 = vsel %vm715_vm13, 65537, %v2965_v0 }
 0x26a   :  { %2300 = vmatpush3.bf16.msra.mxu1 %v2707_v13  ;;  %2334 = vmatpush3.bf16.msra.mxu0 %v2720_v26  ;;  %v630_v50 = vor.u32 %v628_v42, %v627_v44  ;;  %v2124_v54 = vcombine.low %v719_v48, %v3188_v59  ;;  %v652_v13 = vadd.s32 24, %v3178_v51 }
 0x26b   :  { %2301 = vmatprep.subr.bf16.mxu1 %v2709_v15  ;;  %2335 = vmatprep.subr.bf16.mxu0 %v2722_v31  ;;  %v2737_v15 = vld [vmem:[#allocation10 + $0x138] sm:$0xff]  }
 0x26c   :  { %v631_v61 = vsel %vm616_vm8, %v3193_v63, %v630_v50  ;;  %vm3223_vm14 = vcmp.eq.s16.totalorder %v2124_v54, 0  ;;  %v638_v63 = vrot.slane %v621_v62, 1  ;;  %v678_v16 = vand.u32 15, %v652_v13 }
 0x26d   :  { %2178 = vmatmul.mubr.msk.bf16.gmra.mrb[8].mxu0 %vm3223_vm14, %v631_v61 }
 0x26e   :  { %2302 = vmatpush3.bf16.msra.mxu1 %v2711_v17  ;;  %2336 = vmatpush3.bf16.msra.mxu0 %v2724_v35  ;;  %v3234_v17 = vsel %vm744_vm0, 65537, %v2965_v0  ;;  %vm734_vm5 = vcmp.eq.s32.totalorder %v678_v16, 15  ;;  %v639_v62 = vor.u32 %v638_v63, %v618_v58  ;;  %vm645_vm0 = vcmask 1047552  }
 0x26f   :  { %2303 = vmatprep.subr.bf16.mxu1 %v2713_v19  ;;  %2337 = vmatprep.subr.bf16.mxu0 %v2726_v41  ;;  %v2125_v18 = vcombine.low %v3188_v59, %v3234_v17  ;;  %vm746_vm6 = vmpackc.low %vm734_vm5, %vm734_vm5  ;;  %v640_v19 = vrot.slane %v628_v42, 1 }
 0x270   :  { %v3241_v20 = vsel %vm746_vm6, 65537, %v2965_v0  ;;  %vm3279_vm6 = vmand %vm645_vm0, %vm637_vm7 }
 0x271   :  { %v3247_v22 = vsel %vm637_vm7, %v639_v62, %v640_v19  ;;  %vm3274_vm5 = vcmp.eq.s16.totalorder %v2125_v18, 0 }
 0x272   :  { %2304 = vmatpush3.bf16.msra.mxu1 %v2715_v21  ;;  %2338 = vmatpush3.bf16.msra.mxu0 %v2728_v47  ;;  %v2126_v21 = vcombine.low %v3188_v59, %v3241_v20 }
 0x273   :  { %2305 = vmatprep.subr.bf16.mxu1 %v2717_v23  ;;  %2339 = vmatprep.subr.bf16.mxu0 %v2731_v57  ;;  %v3249_v23 = vor.u32 %v640_v19, %v625_v38 }
 0x276   :  { %2306 = vmatpush3.bf16.msra.mxu1 %v2719_v25  ;;  %2340 = vmatpush3.bf16.msra.mxu0 %v2733_v4  ;;  %v514_v25 = vunpack.c.l.s4 %v2969_v24 }
 0x277   :  { %2307 = vmatprep.subr.bf16.mxu1 %v2721_v29  ;;  %2341 = vmatprep.subr.bf16.mxu0 %v2735_v9  ;;  %v3256_v29 = vsub.s32 0, %v3178_v51 }
 0x278   :  { %v515_v26 = vunpack.c.0.s8 %v514_v25 }
 0x27a   :  { %2308 = vmatpush3.bf16.msra.mxu1 %v2723_v33  ;;  %2342 = vmatpush3.bf16.msra.mxu0 %v2737_v15  ;;  %v3252_v56 = vsub.s32 %v515_v26, %v3178_v51 }
 0x27b   :  { %2309 = vmatprep.subr.bf16.mxu1 %v2725_v39 }
 0x27e   :  { %2310 = vmatpush3.bf16.msra.mxu1 %v2727_v45 }
 0x27f   :  { %2311 = vmatprep.subr.bf16.mxu1 %v2730_v55 }
 0x282   :  { %2312 = vmatpush3.bf16.msra.mxu1 %v2732_v60 }
 0x283   :  { %2313 = vmatprep.subr.bf16.mxu1 %v2734_v5 }
 0x286   :  { %2314 = vmatpush3.bf16.msra.mxu1 %v2736_v14 }
 0x287   :  { %2598 = vmatprep.subr.bf16.mxu1 %v2966_v30 }
 0x33c   :  { %v500_v58 = vpop.f32.mrb[4].mxu1 }
 0x33d   :  { %v504_v27 = vmul.f32 %v500_v58, %v500_v58  ;;  %v519_v0 = vrot.slane %v500_v58, %v3252_v56  ;;  %v2475_v31 = vpop.f32.mrb[5].mxu1 }
 0x33f   :  { %v506_v32 = vrot.slane %v504_v27, 6  ;;  %v520_v33 = vcombine.high %v519_v0, %v519_v0  ;;  %v527_v35 = vrot.slane %v519_v0, %v3252_v56 }
 0x341   :  { %v508_v36 = vsub.f32 %v500_v58, %v506_v32  ;;  %v534_v38 = vrot.slane %v520_v33, %v3252_v56  ;;  %v538_v39 = vrot.slane %v527_v35, %v3256_v29 }
 0x343   :  { %v509_v41 = vmax.f32 %v508_v36, 0.0  ;;  %v542_v42 = vrot.slane %v534_v38, %v3256_v29  ;;  %v545_v44 = vsub.f32 %v3159_v3, %v538_v39  ;;  %v546_v45 = vsub.f32 %v3155_v1, %v538_v39 }
 0x345   :  { %v510_v47 = vadd.f32 1e-05, %v509_v41  ;;  %v547_v51 = vsub.f32 %v3169_v10, %v542_v42  ;;  %v548_v48 = vsub.f32 %v3165_v8, %v542_v42 }
 0x347   :  { %2762 = vrsqrt.f32 %v510_v47 }
 0x351   :  { %v2763_v50 = vpop.eup %2762 }
 0x352   :  { %v556_v54 = vrot.slane %v2763_v50, %v3252_v56 }
 0x354   :  { %v557_v55 = vcombine.high %v556_v54, %v556_v54  ;;  %v564_v57 = vrot.slane %v556_v54, %v3252_v56 }
 0x356   :  { %v571_v60 = vrot.slane %v557_v55, %v3252_v56  ;;  %v572_v61 = vcombine.high %v564_v57, %v564_v57 }
 0x358   :  { %v573_v4 = vcombine.high %v571_v60, %v571_v60  ;;  %v577_v3 = vrot.slane %v572_v61, %v3256_v29 }
 0x35a   :  { %v581_v1 = vrot.slane %v573_v4, %v3256_v29  ;;  %v584_v5 = vmul.f32 %v577_v3, %v545_v44  ;;  %v585_v7 = vmul.f32 %v577_v3, %v546_v45 }
 0x35c   :  { %v586_v10 = vmul.f32 %v581_v1, %v547_v51  ;;  %v587_v9 = vmul.f32 %v581_v1, %v548_v48  ;;  %v592_v8 = vmul.f32 0.01, %v584_v5  ;;  %v593_v11 = vmul.f32 0.01, %v585_v7 }
 0x35d   :  { %vm588_vm9 = vcmp.ge.f32.partialorder %v584_v5, 0.0  ;;  %vm589_vm12 = vcmp.ge.f32.partialorder %v585_v7, 0.0 }
 0x35e   :  { %v594_v13 = vmul.f32 0.01, %v586_v10  ;;  %v595_v14 = vmul.f32 0.01, %v587_v9  ;;  %v596_v63 = vsel %vm588_vm9, %v584_v5, %v592_v8  ;;  %v597_v15 = vsel %vm589_vm12, %v585_v7, %v593_v11 }
 0x35f   :  { %v600_v16 = vpack.c.bf16 %v597_v15, %v596_v63  ;;  %vm590_vm13 = vcmp.ge.f32.partialorder %v586_v10, 0.0  ;;  %vm591_vm15 = vcmp.ge.f32.partialorder %v587_v9, 0.0  ;;  %vm3286_vm9 = vcmp.eq.s16.totalorder %v2126_v21, 0 }
 0x360   :  { %v598_v62 = vsel %vm590_vm13, %v586_v10, %v594_v13  ;;  %v599_v19 = vsel %vm591_vm15, %v587_v9, %v595_v14  ;;  %v647_v21 = vsel %vm3279_vm6, %v3249_v23, 0 }
 0x361   :  { %v762_v24 = vshrl.u32 %v600_v16, 16  ;;  %v765_v25 = vshll.u32 %v600_v16, 16  ;;  %v601_v26 = vpack.c.bf16 %v599_v19, %v598_v62 }
 0x363   :  { %v764_v58 = vrot.slane %v762_v24, 7  ;;  %v779_v27 = vrot.slane %v765_v25, 1  ;;  %v772_v0 = vshll.u32 %v601_v26, 16  ;;  %v769_v31 = vshrl.u32 %v601_v26, 16 }
 0x365   :  { %v767_v33 = vor.u32 %v765_v25, %v764_v58  ;;  %v780_v35 = vor.u32 %v779_v27, %v762_v24  ;;  %v781_v36 = vrot.slane %v772_v0, 1  ;;  %v771_v38 = vrot.slane %v769_v31, 7 }
 0x367   :  { %v778_v17 = vsel %vm3201_vm10, 0, %v767_v33  ;;  %v782_v18 = vsel %vm637_vm7, %v780_v35, %v781_v36  ;;  %v774_v42 = vor.u32 %v772_v0, %v771_v38  ;;  %v783_v44 = vor.u32 %v781_v36, %v769_v31 }
 0x368   :  { %2180 = vmatprep.mubr.msk.bf16.mxu1 %vm3207_vm11, %v778_v17  ;;  %2188 = vmatprep.mubr.msk.bf16.mxu0 %vm3274_vm5, %v782_v18 }
 0x369   :  { %2182 = vmatmul.mubr.msk.bf16.vlgmr.msra.gmra.mrb[8].mxu1 %vm3274_vm5, %v3247_v22  ;;  %1308 = vmatmul.mubr.bf16.vlgmr.msra.gmra.mrb[12].mxu0 %v600_v16  ;;  %v775_v59 = vsel %vm616_vm8, %v764_v58, %v774_v42  ;;  %v786_v20 = vsel %vm3279_vm6, %v783_v44, 0  ;;  %v2287_v22 = vpop.f32.mrb[4].mxu0 }
 0x36a   :  { %2184 = vmatprep.mubr.msk.bf16.mxu1 %vm3223_vm14, %v775_v59  ;;  %2190 = vmatprep.mubr.msk.bf16.mxu0 %vm3286_vm9, %v786_v20  ;;  %v2288_v23 = vpop.f32.mrb[5].mxu0 }
 0x36b   :  { %2600 = vmatpush3.bf16.msra.mxu1 %v3118_v28  ;;  %v2289_v45 = vadd.f32 %v2288_v23, %v2287_v22  ;;  %v2290_v47 = vpop.f32.mrb[6].mxu0 }
 0x36c   :  { %2601 = vmatprep.subr.bf16.mxu1 %v2966_v30  ;;  %v2291_v51 = vpop.f32.mrb[7].mxu0 }
 0x36d   :  { %v2292_v48 = vadd.f32 %v2291_v51, %v2290_v47  ;;  %v2293_v50 = vpop.f32.mrb[8].mxu0 }
 0x36e   :  { %v2294_v54 = vpop.f32.mrb[9].mxu0 }
 0x36f   :  { %2603 = vmatpush3.bf16.msra.mxu1 %v3124_v34  ;;  %v2295_v55 = vadd.f32 %v2294_v54, %v2293_v50  ;;  %v2296_v57 = vpop.f32.mrb[10].mxu0 }
 0x370   :  { %2604 = vmatprep.subr.bf16.mxu1 %v2966_v30  ;;  %v2297_v60 = vpop.f32.mrb[11].mxu0 }
 0x371   :  { %2186 = vmatmul.mubr.msk.bf16.gmra.mrb[12].mxu1 %vm3286_vm9, %v647_v21  ;;  %1316 = vmatmul.mubr.bf16.gmra.mrb[16].mxu0 %v601_v26  ;;  %v2298_v61 = vadd.f32 %v2297_v60, %v2296_v57 }
 0x372   :  { %2508 = vmatprep.mubr.msk.f32.mxu1 %vm2967_vm1, %v2968_v53 }
 0x373   :  { %2606 = vmatpush3.bf16.msra.mxu1 %v3130_v37 }
 0x374   :  { %2607 = vmatprep.subr.bf16.mxu1 %v2966_v30 }
 0x377   :  { %2609 = vmatpush3.bf16.msra.mxu1 %v3134_v40 }
 0x378   :  { %2610 = vmatprep.subr.bf16.mxu1 %v2966_v30 }
 0x37b   :  { %2612 = vmatpush3.bf16.msra.mxu1 %v3138_v43 }
 0x37c   :  { %2613 = vmatprep.subr.bf16.mxu1 %v2966_v30 }
 0x37f   :  { %2615 = vmatpush3.bf16.msra.mxu1 %v3142_v46 }
 0x380   :  { %2616 = vmatprep.subr.bf16.mxu1 %v2966_v30 }
 0x383   :  { %2618 = vmatpush3.bf16.msra.mxu1 %v3146_v49 }
 0x384   :  { %2619 = vmatprep.subr.bf16.mxu1 %v2966_v30 }
 0x387   :  { %2621 = vmatpush3.bf16.msra.mxu1 %v3150_v52 }
 0x43c   :  { %v2315_v4 = vpop.f32.mrb[8].mxu1  ;;  %v2343_v3 = vpop.f32.mrb[12].mxu0 }
 0x43d   :  { %v2316_v1 = vpop.f32.mrb[9].mxu1  ;;  %v2344_v5 = vpop.f32.mrb[13].mxu0 }
 0x43e   :  { %v2317_v7 = vadd.f32 %v2316_v1, %v2315_v4  ;;  %v2345_v10 = vadd.f32 %v2344_v5, %v2343_v3  ;;  %v2318_v9 = vpop.f32.mrb[10].mxu1  ;;  %v2346_v8 = vpop.f32.mrb[14].mxu0 }
 0x43f   :  { %v2319_v11 = vpop.f32.mrb[11].mxu1  ;;  %v2347_v13 = vpop.f32.mrb[15].mxu0 }
 0x440   :  { %v1261_v14 = vadd.f32 %v2317_v7, %v2289_v45  ;;  %v2320_v63 = vadd.f32 %v2319_v11, %v2318_v9  ;;  %v2348_v15 = vadd.f32 %v2347_v13, %v2346_v8 }
 0x442   :  { %v3329_v16 = vadd.f32 %v2345_v10, %v1261_v14  ;;  %v1264_v62 = vadd.f32 %v2320_v63, %v2292_v48 }
 0x444   :  { %v3331_v19 = vadd.f32 %v2348_v15, %v1264_v62  ;;  %v2321_v24 = vpop.f32.mrb[12].mxu1  ;;  %v2349_v25 = vpop.f32.mrb[16].mxu0  ;;  %v1338_v26 = vmul.f32 %v3329_v16, %v3329_v16 }
 0x445   :  { %v2322_v58 = vpop.f32.mrb[13].mxu1  ;;  %v2350_v27 = vpop.f32.mrb[17].mxu0 }
 0x446   :  { %v1324_v0 = vadd.f32 %v3331_v19, %v3329_v16  ;;  %v1339_v31 = vmul.f32 %v3331_v19, %v3331_v19  ;;  %v2323_v33 = vadd.f32 %v2322_v58, %v2321_v24  ;;  %v2351_v35 = vadd.f32 %v2350_v27, %v2349_v25  ;;  %v2324_v36 = vpop.f32.mrb[14].mxu1  ;;  %v2352_v38 = vpop.f32.mrb[18].mxu0 }
 0x447   :  { %v2325_v17 = vpop.f32.mrb[15].mxu1  ;;  %v2353_v18 = vpop.f32.mrb[19].mxu0 }
 0x448   :  { %v1325_v42 = vrot.slane %v1324_v0, 4  ;;  %v1342_v44 = vadd.f32 %v1339_v31, %v1338_v26  ;;  %v1269_v59 = vadd.f32 %v2323_v33, %v2295_v55  ;;  %v2326_v20 = vadd.f32 %v2325_v17, %v2324_v36  ;;  %v2738_v33 = vld [vmem:[#allocation11 + $0x40] sm:$0xff]   ;;  %v2742_v17 = vld [vmem:[#allocation11 + $0x8] sm:$0xff]  }
 0x449   :  { %v2354_v21 = vadd.f32 %v2353_v18, %v2352_v38  ;;  %2372 = vmatprep.subr.bf16.mxu0 %v2738_v33  ;;  %v2740_v36 = vld [vmem:[#allocation11 + $0x80] sm:$0xff]   ;;  %v2741_v38 = vld [vmem:[#allocation11 + $0x48] sm:$0xff]  }
 0x44a   :  { %v1343_v22 = vrot.slane %v1342_v44, 4  ;;  %v3339_v23 = vadd.f32 %v2351_v35, %v1269_v59  ;;  %v1272_v45 = vadd.f32 %v2326_v20, %v2298_v61  ;;  %v1326_v47 = vadd.f32 %v1325_v42, %v1324_v0  ;;  %v2739_v35 = vld [vmem:[#allocation11] sm:$0xff]   ;;  %2511 = vmatprep.subr.bf16.mxu1 %v2740_v36  ;;  %v2743_v18 = vld [vmem:[#allocation11 + $0x88] sm:$0xff]   ;;  %v2744_v42 = vld [vmem:[#allocation11 + $0x50] sm:$0xff]  }
 0x44b   :  { %2373 = vmatpush3.bf16.msra.mxu0 %v2739_v35  ;;  %v2746_v59 = vld [vmem:[#allocation11 + $0x90] sm:$0xff]   ;;  %v2747_v20 = vld [vmem:[#allocation11 + $0x58] sm:$0xff]  }
 0x44c   :  { %v1344_v51 = vadd.f32 %v1343_v22, %v1342_v44  ;;  %v3341_v48 = vadd.f32 %v2354_v21, %v1272_v45  ;;  %v1340_v50 = vmul.f32 %v3339_v23, %v3339_v23  ;;  %v1327_v55 = vrot.slane %v1326_v47, 2  ;;  %2374 = vmatprep.subr.bf16.mxu0 %v2741_v38  ;;  %v2745_v44 = vld [vmem:[#allocation11 + $0x10] sm:$0xff]   ;;  %v2748_v21 = vld [vmem:[#allocation11 + $0x18] sm:$0xff]   ;;  %v2750_v45 = vld [vmem:[#allocation11 + $0x60] sm:$0xff]  }
 0x44d   :  { %v2749_v22 = vld [vmem:[#allocation11 + $0x98] sm:$0xff]  }
 0x44e   :  { %v1331_v54 = vadd.f32 %v3341_v48, %v3339_v23  ;;  %v1341_v57 = vmul.f32 %v3341_v48, %v3341_v48  ;;  %v1345_v60 = vrot.slane %v1344_v51, 2  ;;  %v1328_v61 = vadd.f32 %v1327_v55, %v1326_v47  ;;  %v2751_v47 = vld [vmem:[#allocation11 + $0x20] sm:$0xff]   ;;  %v2756_v55 = vld [vmem:[#allocation11 + $0x70] sm:$0xff]  }
 0x44f   :  { %2375 = vmatpush3.bf16.msra.mxu0 %v2742_v17 }
 0x450   :  { %v1332_v4 = vrot.slane %v1331_v54, 4  ;;  %v1349_v3 = vadd.f32 %v1341_v57, %v1340_v50  ;;  %v1346_v7 = vadd.f32 %v1345_v60, %v1344_v51  ;;  %v1329_v13 = vrot.slane %v1328_v61, 1  ;;  %2376 = vmatprep.subr.bf16.mxu0 %v2744_v42  ;;  %v2752_v51 = vld [vmem:[#allocation11 + $0xa0] sm:$0xff]   ;;  %v2753_v50 = vld [vmem:[#allocation11 + $0x68] sm:$0xff]   ;;  %v2757_v60 = vld [vmem:[#allocation11 + $0x30] sm:$0xff]  }
 0x451   :  { %v2755_v57 = vld [vmem:[#allocation11 + $0xa8] sm:$0xff]  }
 0x452   :  { %v1333_v1 = vadd.f32 %v1332_v4, %v1331_v54  ;;  %v1350_v5 = vrot.slane %v1349_v3, 4  ;;  %v1347_v15 = vrot.slane %v1346_v7, 1  ;;  %v1330_v25 = vadd.f32 %v1329_v13, %v1328_v61  ;;  %v2754_v54 = vld [vmem:[#allocation11 + $0x28] sm:$0xff]   ;;  %v2758_v4 = vld [vmem:[#allocation11 + $0xb0] sm:$0xff]  }
 0x453   :  { %2377 = vmatpush3.bf16.msra.mxu0 %v2745_v44 }
 0x454   :  { %v1334_v10 = vrot.slane %v1333_v1, 2  ;;  %v1351_v9 = vadd.f32 %v1350_v5, %v1349_v3  ;;  %v1348_v26 = vadd.f32 %v1347_v15, %v1346_v7  ;;  %2378 = vmatprep.subr.bf16.mxu0 %v2747_v20  ;;  %v2759_v3 = vld [vmem:[#allocation11 + $0x78] sm:$0xff]  }
 0x455   :  { %v2761_v5 = vld [vmem:[#allocation11 + $0xb8] sm:$0xff]  }
 0x456   :  { %v1335_v8 = vadd.f32 %v1334_v10, %v1333_v1  ;;  %v1352_v11 = vrot.slane %v1351_v9, 2  ;;  %v2760_v1 = vld [vmem:[#allocation11 + $0x38] sm:$0xff]  }
 0x457   :  { %2379 = vmatpush3.bf16.msra.mxu0 %v2748_v21 }
 0x458   :  { %v1336_v14 = vrot.slane %v1335_v8, 1  ;;  %v1353_v63 = vadd.f32 %v1352_v11, %v1351_v9  ;;  %2380 = vmatprep.subr.bf16.mxu0 %v2750_v45 }
 0x45a   :  { %v1337_v62 = vadd.f32 %v1336_v14, %v1335_v8  ;;  %v1354_v24 = vrot.slane %v1353_v63, 1 }
 0x45b   :  { %2381 = vmatpush3.bf16.msra.mxu0 %v2751_v47 }
 0x45c   :  { %v1355_v58 = vadd.f32 %v1354_v24, %v1353_v63  ;;  %v1358_v27 = vsel %vm424_vm2, %v1337_v62, %v1330_v25  ;;  %2382 = vmatprep.subr.bf16.mxu0 %v2753_v50 }
 0x45e   :  { %v1362_v0 = vsel %vm429_vm3, %v1355_v58, %v1348_v26 }
 0x45f   :  { %v1364_v31 = vsel %vm432_vm4, %v1358_v27, %v1362_v0  ;;  %2383 = vmatpush3.bf16.msra.mxu0 %v2754_v54 }
 0x460   :  { %2509 = vmatmul.mubr.f32.vlgmr.msra.gmra.mrb[6].mxu1 %v1364_v31  ;;  %2384 = vmatprep.subr.bf16.mxu0 %v2756_v55 }
 0x461   :  { %2512 = vmatpush3.bf16.msra.mxu1 %v2740_v36 }
 0x462   :  { %2513 = vmatprep.subr.bf16.mxu1 %v2743_v18 }
 0x463   :  { %2385 = vmatpush3.bf16.msra.mxu0 %v2757_v60 }
 0x464   :  { %2386 = vmatprep.subr.bf16.mxu0 %v2759_v3 }
 0x465   :  { %2514 = vmatpush3.bf16.msra.mxu1 %v2743_v18 }
 0x466   :  { %2515 = vmatprep.subr.bf16.mxu1 %v2746_v59 }
 0x467   :  { %2387 = vmatpush3.bf16.msra.mxu0 %v2760_v1 }
 0x468   :  { %2622 = vmatprep.subr.bf16.mxu0 %v2966_v30 }
 0x469   :  { %2516 = vmatpush3.bf16.msra.mxu1 %v2746_v59 }
 0x46a   :  { %2517 = vmatprep.subr.bf16.mxu1 %v2749_v22 }
 0x46d   :  { %2518 = vmatpush3.bf16.msra.mxu1 %v2749_v22 }
 0x46e   :  { %2519 = vmatprep.subr.bf16.mxu1 %v2752_v51 }
 0x471   :  { %2520 = vmatpush3.bf16.msra.mxu1 %v2752_v51 }
 0x472   :  { %2521 = vmatprep.subr.bf16.mxu1 %v2755_v57 }
 0x475   :  { %2522 = vmatpush3.bf16.msra.mxu1 %v2755_v57 }
 0x476   :  { %2523 = vmatprep.subr.bf16.mxu1 %v2758_v4 }
 0x479   :  { %2524 = vmatpush3.bf16.msra.mxu1 %v2758_v4 }
 0x47a   :  { %2525 = vmatprep.subr.bf16.mxu1 %v2761_v5 }
 0x47d   :  { %2526 = vmatpush3.bf16.msra.mxu1 %v2761_v5 }
 0x533   :  { %v1431_v61 = vpop.f32.mrb[6].mxu1 }
 0x534   :  { %v1435_v7 = vmul.f32 %v1431_v61, %v1431_v61  ;;  %v2510_v10 = vpop.f32.mrb[7].mxu1  ;;  %v1450_v14 = vrot.slane %v1431_v61, %v3252_v56 }
 0x536   :  { %v1437_v9 = vrot.slane %v1435_v7, 6  ;;  %v1451_v63 = vcombine.high %v1450_v14, %v1450_v14  ;;  %v1458_v15 = vrot.slane %v1450_v14, %v3252_v56 }
 0x538   :  { %v1439_v8 = vsub.f32 %v1431_v61, %v1437_v9  ;;  %v1465_v24 = vrot.slane %v1451_v63, %v3252_v56  ;;  %v1469_v26 = vrot.slane %v1458_v15, %v3256_v29 }
 0x53a   :  { %v1440_v11 = vmax.f32 %v1439_v8, 0.0  ;;  %v1473_v0 = vrot.slane %v1465_v24, %v3256_v29  ;;  %v1476_v35 = vsub.f32 %v3329_v16, %v1469_v26  ;;  %v1477_v36 = vsub.f32 %v3331_v19, %v1469_v26 }
 0x53c   :  { %v1441_v13 = vadd.f32 1e-05, %v1440_v11  ;;  %v1478_v18 = vsub.f32 %v3339_v23, %v1473_v0  ;;  %v1479_v42 = vsub.f32 %v3341_v48, %v1473_v0 }
 0x53e   :  { %2764 = vrsqrt.f32 %v1441_v13 }
 0x548   :  { %v2765_v62 = vpop.eup %2764 }
 0x549   :  { %v1487_v25 = vrot.slane %v2765_v62, %v3252_v56 }
 0x54b   :  { %v1488_v58 = vcombine.high %v1487_v25, %v1487_v25  ;;  %v1495_v27 = vrot.slane %v1487_v25, %v3252_v56 }
 0x54d   :  { %v1502_v31 = vrot.slane %v1488_v58, %v3252_v56  ;;  %v1503_v33 = vcombine.high %v1495_v27, %v1495_v27 }
 0x54f   :  { %v1504_v38 = vcombine.high %v1502_v31, %v1502_v31  ;;  %v1508_v17 = vrot.slane %v1503_v33, %v3256_v29 }
 0x551   :  { %v1512_v44 = vrot.slane %v1504_v38, %v3256_v29  ;;  %v1515_v59 = vmul.f32 %v1508_v17, %v1476_v35  ;;  %v1516_v20 = vmul.f32 %v1508_v17, %v1477_v36 }
 0x553   :  { %v1517_v21 = vmul.f32 %v1512_v44, %v1478_v18  ;;  %v1518_v22 = vmul.f32 %v1512_v44, %v1479_v42  ;;  %vm1519_vm12 = vcmp.ge.f32.partialorder %v1515_v59, 0.0  ;;  %vm1520_vm13 = vcmp.ge.f32.partialorder %v1516_v20, 0.0 }
 0x554   :  { %v1523_v45 = vmul.f32 0.01, %v1515_v59  ;;  %v1524_v47 = vmul.f32 0.01, %v1516_v20 }
 0x555   :  { %v1525_v16 = vmul.f32 0.01, %v1517_v21  ;;  %v1526_v51 = vmul.f32 0.01, %v1518_v22  ;;  %vm1521_vm15 = vcmp.ge.f32.partialorder %v1517_v21, 0.0  ;;  %vm1522_vm0 = vcmp.ge.f32.partialorder %v1518_v22, 0.0 }
 0x556   :  { %v1527_v19 = vsel %vm1519_vm12, %v1515_v59, %v1523_v45  ;;  %v1528_v50 = vsel %vm1520_vm13, %v1516_v20, %v1524_v47 }
 0x557   :  { %v1531_v54 = vpack.c.bf16 %v1528_v50, %v1527_v19  ;;  %v1529_v23 = vsel %vm1521_vm15, %v1517_v21, %v1525_v16  ;;  %v1530_v57 = vsel %vm1522_vm0, %v1518_v22, %v1526_v51 }
 0x558   :  { %v1532_v48 = vpack.c.bf16 %v1530_v57, %v1529_v23 }
 0x559   :  { %v1534_v55 = vshrl.u32 %v1531_v54, 16  ;;  %v1537_v60 = vshll.u32 %v1531_v54, 16  ;;  %1787 = vmatprep.mubr.bf16.mxu0 %v1531_v54 }
 0x55a   :  { %v1544_v4 = vshll.u32 %v1532_v48, 16  ;;  %v1541_v5 = vshrl.u32 %v1532_v48, 16 }
 0x55b   :  { %v1536_v3 = vrot.slane %v1534_v55, 7  ;;  %v1551_v1 = vrot.slane %v1537_v60, 1 }
 0x55c   :  { %v1553_v61 = vrot.slane %v1544_v4, 1  ;;  %v1543_v13 = vrot.slane %v1541_v5, 7 }
 0x55d   :  { %v1539_v7 = vor.u32 %v1537_v60, %v1536_v3  ;;  %v1552_v10 = vor.u32 %v1551_v1, %v1534_v55 }
 0x55e   :  { %v1555_v9 = vor.u32 %v1553_v61, %v1541_v5  ;;  %v1546_v6 = vor.u32 %v1544_v4, %v1543_v13 }
 0x55f   :  { %v1550_v8 = vsel %vm3201_vm10, 0, %v1539_v7  ;;  %v1554_v11 = vsel %vm637_vm7, %v1552_v10, %v1553_v61 }
 0x560   :  { %2216 = vmatmul.mubr.msk.bf16.vlgmr.msra.gmra.mrb[20].mxu0 %vm3207_vm11, %v1550_v8  ;;  %2527 = vmatprep.mubr.msk.bf16.mxu1 %vm3274_vm5, %v1554_v11  ;;  %v1558_v14 = vsel %vm3279_vm6, %v1555_v9, 0  ;;  %v1547_v12 = vsel %vm616_vm8, %v1536_v3, %v1546_v6 }
 0x561   :  { %1795 = vmatprep.mubr.bf16.mxu0 %v1532_v48  ;;  %2528 = vmatmul.mubr.msk.bf16.vlgmr.msra.gmra.mrb[16].mxu1 %vm3286_vm9, %v1558_v14 }
 0x562   :  { %2624 = vmatpush3.bf16.msra.mxu0 %v3118_v28 }
 0x563   :  { %2625 = vmatprep.subr.bf16.mxu0 %v2966_v30 }
 0x566   :  { %2627 = vmatpush3.bf16.msra.mxu0 %v3124_v34 }
 0x567   :  { %2628 = vmatprep.subr.bf16.mxu0 %v2966_v30 }
 0x568   :  { %2218 = vmatmul.mubr.msk.bf16.gmra.mrb[24].mxu0 %vm3223_vm14, %v1547_v12 }
 0x569   :  { %2563 = vmatprep.mubr.msk.f32.mxu0 %vm2967_vm1, %v2968_v53 }
 0x56a   :  { %2630 = vmatpush3.bf16.msra.mxu0 %v3130_v37 }
 0x56b   :  { %2631 = vmatprep.subr.bf16.mxu0 %v2966_v30 }
 0x56e   :  { %2633 = vmatpush3.bf16.msra.mxu0 %v3134_v40 }
 0x56f   :  { %2634 = vmatprep.subr.bf16.mxu0 %v2966_v30 }
 0x572   :  { %2636 = vmatpush3.bf16.msra.mxu0 %v3138_v43 }
 0x573   :  { %2637 = vmatprep.subr.bf16.mxu0 %v2966_v30 }
 0x576   :  { %2639 = vmatpush3.bf16.msra.mxu0 %v3142_v46 }
 0x577   :  { %2640 = vmatprep.subr.bf16.mxu0 %v2966_v30 }
 0x57a   :  { %2642 = vmatpush3.bf16.msra.mxu0 %v3146_v49 }
 0x57b   :  { %2643 = vmatprep.subr.bf16.mxu0 %v2966_v30 }
 0x57e   :  { %2645 = vmatpush3.bf16.msra.mxu0 %v3150_v52 }
 0x633   :  { %v2388_v28 = vpop.f32.mrb[20].mxu0 }
 0x634   :  { %v2389_v34 = vpop.f32.mrb[21].mxu0  ;;  %v2529_v37 = vpop.f32.mrb[16].mxu1 }
 0x635   :  { %v2390_v40 = vadd.f32 %v2389_v34, %v2388_v28  ;;  %v2391_v53 = vpop.f32.mrb[22].mxu0  ;;  %v1838_v2 = vpop.f32.mrb[17].mxu1 }
 0x636   :  { %v2392_v32 = vpop.f32.mrb[23].mxu0  ;;  %v2530_v43 = vpop.f32.mrb[18].mxu1 }
 0x637   :  { %v2393_v39 = vadd.f32 %v2392_v32, %v2391_v53  ;;  %v3398_v41 = vadd.f32 %v2390_v40, %v1838_v2  ;;  %v1841_v46 = vpop.f32.mrb[19].mxu1 }
 0x639   :  { %v3400_v63 = vadd.f32 %v2393_v39, %v1841_v46  ;;  %v1867_v49 = vmul.f32 %v3398_v41, %v3398_v41 }
 0x63b   :  { %v1853_v30 = vadd.f32 %v3400_v63, %v3398_v41  ;;  %v1868_v52 = vmul.f32 %v3400_v63, %v3400_v63  ;;  %v2394_v15 = vpop.f32.mrb[24].mxu0 }
 0x63c   :  { %v2395_v62 = vpop.f32.mrb[25].mxu0 }
 0x63d   :  { %v1854_v24 = vrot.slane %v1853_v30, 4  ;;  %v1871_v25 = vadd.f32 %v1868_v52, %v1867_v49  ;;  %v2396_v26 = vadd.f32 %v2395_v62, %v2394_v15  ;;  %v2397_v58 = vpop.f32.mrb[26].mxu0 }
 0x63e   :  { %v2398_v27 = vpop.f32.mrb[27].mxu0 }
 0x63f   :  { %v1872_v0 = vrot.slane %v1871_v25, 4  ;;  %v3408_v31 = vadd.f32 %v2529_v37, %v2396_v26  ;;  %v2399_v33 = vadd.f32 %v2398_v27, %v2397_v58  ;;  %v1855_v35 = vadd.f32 %v1854_v24, %v1853_v30 }
 0x641   :  { %v1873_v36 = vadd.f32 %v1872_v0, %v1871_v25  ;;  %v1850_v38 = vadd.f32 %v2530_v43, %v2399_v33  ;;  %v1869_v17 = vmul.f32 %v3408_v31, %v3408_v31  ;;  %v1856_v44 = vrot.slane %v1855_v35, 2 }
 0x643   :  { %v1860_v18 = vadd.f32 %v1850_v38, %v3408_v31  ;;  %v1870_v42 = vmul.f32 %v1850_v38, %v1850_v38  ;;  %v1874_v59 = vrot.slane %v1873_v36, 2  ;;  %v1857_v47 = vadd.f32 %v1856_v44, %v1855_v35 }
 0x645   :  { %v1861_v20 = vrot.slane %v1860_v18, 4  ;;  %v1878_v21 = vadd.f32 %v1870_v42, %v1869_v17  ;;  %v1875_v16 = vadd.f32 %v1874_v59, %v1873_v36  ;;  %v1858_v23 = vrot.slane %v1857_v47, 1 }
 0x647   :  { %v1862_v22 = vadd.f32 %v1861_v20, %v1860_v18  ;;  %v1879_v45 = vrot.slane %v1878_v21, 4  ;;  %v1876_v57 = vrot.slane %v1875_v16, 1  ;;  %v1859_v3 = vadd.f32 %v1858_v23, %v1857_v47 }
 0x649   :  { %v1863_v51 = vrot.slane %v1862_v22, 2  ;;  %v1880_v19 = vadd.f32 %v1879_v45, %v1878_v21  ;;  %v1877_v1 = vadd.f32 %v1876_v57, %v1875_v16 }
 0x64b   :  { %v1864_v50 = vadd.f32 %v1863_v51, %v1862_v22  ;;  %v1881_v54 = vrot.slane %v1880_v19, 2 }
 0x64d   :  { %v1865_v48 = vrot.slane %v1864_v50, 1  ;;  %v1882_v55 = vadd.f32 %v1881_v54, %v1880_v19 }
 0x64f   :  { %v1866_v60 = vadd.f32 %v1865_v48, %v1864_v50  ;;  %v1883_v4 = vrot.slane %v1882_v55, 1 }
 0x651   :  { %v1884_v5 = vadd.f32 %v1883_v4, %v1882_v55  ;;  %v1887_v61 = vsel %vm424_vm2, %v1866_v60, %v1859_v3 }
 0x653   :  { %v1891_v7 = vsel %vm429_vm3, %v1884_v5, %v1877_v1 }
 0x654   :  { %v1893_v10 = vsel %vm432_vm4, %v1887_v61, %v1891_v7 }
 0x655   :  { %2564 = vmatmul.mubr.f32.vlgmr.msra.gmra.mrb[28].mxu0 %v1893_v10 }
 0x728   :  { %v1960_v9 = vpop.f32.mrb[28].mxu0 }
 0x729   :  { %v1964_v8 = vmul.f32 %v1960_v9, %v1960_v9  ;;  %v2565_v11 = vpop.f32.mrb[29].mxu0  ;;  %v1979_v28 = vrot.slane %v1960_v9, %v3252_v56 }
 0x72b   :  { %v1966_v13 = vrot.slane %v1964_v8, 6  ;;  %v1980_v34 = vcombine.high %v1979_v28, %v1979_v28  ;;  %v1987_v37 = vrot.slane %v1979_v28, %v3252_v56 }
 0x72d   :  { %v1968_v14 = vsub.f32 %v1960_v9, %v1966_v13  ;;  %v1994_v53 = vrot.slane %v1980_v34, %v3252_v56  ;;  %v1998_v32 = vrot.slane %v1987_v37, %v3256_v29 }
 0x72f   :  { %v1969_v6 = vmax.f32 %v1968_v14, 0.0  ;;  %v2002_v46 = vrot.slane %v1994_v53, %v3256_v29  ;;  %v2005_v52 = vsub.f32 %v3398_v41, %v1998_v32  ;;  %v2006_v15 = vsub.f32 %v3400_v63, %v1998_v32 }
 0x731   :  { %v1970_v12 = vadd.f32 1e-05, %v1969_v6  ;;  %v2007_v25 = vsub.f32 %v3408_v31, %v2002_v46  ;;  %v2008_v26 = vsub.f32 %v1850_v38, %v2002_v46 }
 0x733   :  { %2766 = vrsqrt.f32 %v1970_v12 }
 0x73d   :  { %v2767_v40 = vpop.eup %2766 }
 0x73e   :  { %v2016_v2 = vrot.slane %v2767_v40, %v3252_v56 }
 0x740   :  { %v2017_v43 = vcombine.high %v2016_v2, %v2016_v2  ;;  %v2024_v39 = vrot.slane %v2016_v2, %v3252_v56 }
 0x742   :  { %v2031_v49 = vrot.slane %v2017_v43, %v3252_v56  ;;  %v2032_v30 = vcombine.high %v2024_v39, %v2024_v39 }
 0x744   :  { %v2033_v62 = vcombine.high %v2031_v49, %v2031_v49  ;;  %v2037_v24 = vrot.slane %v2032_v30, %v3256_v29 }
 0x746   :  { %v2041_v58 = vrot.slane %v2033_v62, %v3256_v29  ;;  %v2044_v27 = vmul.f32 %v2037_v24, %v2005_v52  ;;  %v2045_v0 = vmul.f32 %v2037_v24, %v2006_v15 }
 0x748   :  { %v2046_v33 = vmul.f32 %v2041_v58, %v2007_v25  ;;  %v2047_v35 = vmul.f32 %v2041_v58, %v2008_v26  ;;  %vm2048_vm1 = vcmp.ge.f32.partialorder %v2044_v27, 0.0  ;;  %vm2049_vm2 = vcmp.ge.f32.partialorder %v2045_v0, 0.0 }
 0x749   :  { %v2052_v56 = vmul.f32 0.01, %v2044_v27  ;;  %v2053_v36 = vmul.f32 0.01, %v2045_v0 }
 0x74a   :  { %vm2050_vm3 = vcmp.ge.f32.partialorder %v2046_v33, 0.0  ;;  %vm2051_vm4 = vcmp.ge.f32.partialorder %v2047_v35, 0.0  ;;  %v2054_v41 = vmul.f32 0.01, %v2046_v33  ;;  %v2055_v63 = vmul.f32 0.01, %v2047_v35 }
 0x74b   :  { %v2056_v17 = vsel %vm2048_vm1, %v2044_v27, %v2052_v56  ;;  %v2057_v18 = vsel %vm2049_vm2, %v2045_v0, %v2053_v36 }
 0x74c   :  { %v2058_v31 = vsel %vm2050_vm3, %v2046_v33, %v2054_v41  ;;  %v2059_v38 = vsel %vm2051_vm4, %v2047_v35, %v2055_v63  ;;  %v2234_v42 = vpack.c.bf16 %v2057_v18, %v2056_v17 }
 0x74d   :  { %v2239_v29 = vpack.c.bf16 %v2059_v38, %v2058_v31 }
 0x74e   :  { %2235 = vst [vmem:[#allocation14] sm:$0xff] %v2234_v42  }
 0x74f   :  { %2241 = vst [vmem:[#allocation14 + $0x8] sm:$0xff] %v2239_v29  }
 0x750   :  { %2933 = shalt.err (!%p2930_p4)
}
 0x751   :  { %s2934_s21 = scalar_lea.hbm %s3451_s7, 256 }
 0x752   :  { %p2935_p5 = scmp.ne.s32.totalorder %s3451_s7, %s2934_s21  ;;  %p2938_p6 = scmp.lt.u32.totalorder %s2934_s21, %s3451_s7 }
 0x754   :  { %p2940_p7 = pnand %p2938_p6, %p2935_p5 }
 0x756   :  { %2943 = shalt.err (!%p2940_p7)
}
 0x757   :  { %2091 = dma.vmem_to_hbm [thread:$0]  %s2086_s25, 256, %s3451_s7, [#allocation4], %s2955_s11, %s2955_s11, %s2956_s12  }
 0x758   :  { %2952 = dma.done.wait [#allocation4], 256  }
 0x759   :  { %2953 = vsyncadd [#allocation4], 4294967040 }
 0x75a   :  { %2095 = vsyncpa [#allocation3], 1 }
 0x75b   :  { %2096 = vsyncpa [#allocation6], 1 }
 0x75c   :  { %2097 = vsyncpa [#allocation9], 1 }
 0x75d   :  { %2098 = vsyncpa [#allocation12], 1 }
 0x75e   :  { %2099 = vsyncpa [#allocation4], 1 }

</bundles_post_ra>
